<compile_context>
chip_gen: v5e
topology: v5e:2x2
jax: 0.10.0
libtpu: 0.0.40
codegen_flags: <defaults>
</compile_context>

<pallas_src>
import functools

import jax
import jax.numpy as jnp
from jax.experimental import pallas as pl
from jax.experimental.pallas import tpu as pltpu


_MIB = 1024 * 1024


def _tpu_vmem_capacity_bytes():
    """Physical per-core VMEM (128 MiB v5e/v6e, 64 MiB v7x); safe fallback."""
    try:
        return int(pltpu.get_tpu_info().vmem_capacity_bytes)
    except Exception:
        return 128 * _MIB


def _seq_tile(n, max_tile):
    """Largest tile <= max_tile that divides n and is a multiple of 8."""
    if n <= max_tile:
        return n
    for t in range(max_tile, 7, -8):
        if n % t == 0:
            return t
    # Fallback: single full-N tile (correct; block_shape == full dim).
    # TODO(synk): pad ragged N (e.g. 197 tokens) to a multiple of 8 instead of
    # letting a full-N tile silently blow the VMEM budget for huge N.
    return n


def _layernorm(x, gamma, beta, eps=1e-5):
    # x: (R, C) f32; gamma/beta: (1, C). PyTorch LayerNorm (biased variance).
    mean = jnp.mean(x, axis=-1, keepdims=True)
    xc = x - mean
    var = jnp.mean(xc * xc, axis=-1, keepdims=True)
    inv = jax.lax.rsqrt(var + eps)
    return xc * inv * gamma + beta


def _gelu(x, tanh_approx):
    if tanh_approx:
        # Cheaper on bf16-capable EUP generations (v6e/v7x); ~1e-3 deviation.
        c = 0.7978845608028654  # sqrt(2/pi)
        return 0.5 * x * (1.0 + jnp.tanh(c * (x + 0.044715 * x * x * x)))
    # nn.GELU() default: exact erf formulation (module semantics), f32.
    return 0.5 * x * (1.0 + jax.lax.erf(x * 0.7071067811865476))


# ---------------------------------------------------------------------------
# Kernel 1: LN1 + Q/K/V projections, tiled over (batch, sequence rows).
# Outputs q/k/v in the PyTorch channel order (head-major, D-minor) so no
# activation transpose is ever needed downstream.
# ---------------------------------------------------------------------------
def _ln_qkv_kernel(x_ref, g1_ref, b1_ref,
                   wq_ref, wk_ref, wv_ref, bq_ref, bk_ref, bv_ref,
                   q_ref, k_ref, v_ref):
    x = x_ref[0]                                               # (TR, C) f32
    xn = _layernorm(x, g1_ref[...], b1_ref[...]).astype(jnp.bfloat16)
    q = jnp.dot(xn, wq_ref[...], preferred_element_type=jnp.float32) + bq_ref[...]
    k = jnp.dot(xn, wk_ref[...], preferred_element_type=jnp.float32) + bk_ref[...]
    v = jnp.dot(xn, wv_ref[...], preferred_element_type=jnp.float32) + bv_ref[...]
    q_ref[0] = q.astype(q_ref.dtype)                           # bf16, q pre-scaled
    k_ref[0] = k.astype(k_ref.dtype)
    v_ref[0] = v.astype(v_ref.dtype)


# ---------------------------------------------------------------------------
# Kernel 2: attention (per-head loop) + single K=C projection + residual +
#           LN2 + MLP + residual, tiled over (batch, query rows).
# ---------------------------------------------------------------------------
def _attn_mlp_kernel(num_heads, head_dim, gelu_tanh,
                     x_ref, q_ref, k_ref, v_ref,
                     wproj_ref, bproj_ref, g2_ref, b2_ref,
                     wfc1_ref, bfc1_ref, wfc2_ref, bfc2_ref,
                     o_ref, ctx_ref):
    bf16 = jnp.bfloat16
    x = x_ref[0]                     # (TQ, C) f32
    q = q_ref[0]                     # (TQ, C) bf16, already scaled by 1/sqrt(D)
    k = k_ref[0]                     # (N,  C) bf16
    v = v_ref[0]                     # (N,  C) bf16

    # Per-head attention: only one (TQ, N) f32 score slab is live at a time.
    # Heads are static lane slices (h*D .. (h+1)*D) of the packed channel axis.
    for h in range(num_heads):
        lo = h * head_dim
        q_h = q[:, lo:lo + head_dim]                     # (TQ, D) bf16
        k_h = k[:, lo:lo + head_dim]                     # (N,  D) bf16
        v_h = v[:, lo:lo + head_dim]                     # (N,  D) bf16
        s = jnp.einsum('qd,kd->qk', q_h, k_h,
                       preferred_element_type=jnp.float32)      # (TQ, N) f32
        s = s - jnp.max(s, axis=-1, keepdims=True)
        p = jnp.exp(s)                                          # f32, <= 1
        denom = jnp.sum(p, axis=-1, keepdims=True)              # (TQ, 1) f32
        ctx_h = jnp.dot(p.astype(bf16), v_h,
                        preferred_element_type=jnp.float32)     # (TQ, D) f32
        # Normalize the small (TQ, D) context instead of the (TQ, N) probs.
        ctx_ref[:, lo:lo + head_dim] = ctx_h * pl.reciprocal(denom, approx=True)

    # Merge heads through ONE full-depth (K = C) projection matmul:
    # ctx scratch columns are h-major/d-minor, matching Wproj's row order.
    attn = jnp.dot(ctx_ref[...].astype(bf16), wproj_ref[...],
                   preferred_element_type=jnp.float32) + bproj_ref[...]
    x1 = x + attn                                               # residual 1 (f32)

    xn2 = _layernorm(x1, g2_ref[...], b2_ref[...]).astype(bf16)
    hid = jnp.dot(xn2, wfc1_ref[...],
                  preferred_element_type=jnp.float32) + bfc1_ref[...]
    hid = _gelu(hid, gelu_tanh)
    mlp = jnp.dot(hid.astype(bf16), wfc2_ref[...],
                  preferred_element_type=jnp.float32) + bfc2_ref[...]
    o_ref[0] = (x1 + mlp).astype(o_ref.dtype)                   # residual 2


# ---------------------------------------------------------------------------
# Wrapper: only parameter reshuffling happens in XLA (done once, tiny).
# ---------------------------------------------------------------------------
def vit_block(x, params, num_heads, gelu_tanh=False):
    B, N, C = x.shape
    assert C % num_heads == 0
    D = C // num_heads
    H = params["wfc1"].shape[1]
    scale = float(D) ** -0.5
    bf16 = jnp.bfloat16

    # Generation-aware knobs: v7x has 64 MiB VMEM/core, v5e/v6e have 128 MiB.
    vmem_cap = _tpu_vmem_capacity_bytes()
    vmem_limit = min(100 * _MIB, int(vmem_cap * 0.8))   # ~50 MiB v7x, ~100 MiB v5e/v6e
    max_tile = 128 if vmem_cap <= 96 * _MIB else 256

    # ---- parameter prep (weights only; pure XLA, executed once) ----
    wqkv = params["wqkv"].astype(jnp.float32)           # (C, 3C), [q|k|v] columns
    bqkv = params["bqkv"].astype(jnp.float32)           # (1, 3C)
    # Fold 1/sqrt(D) into the q projection (note: applied pre-bf16-cast).
    wq = (wqkv[:, :C] * scale).astype(bf16)
    wk = wqkv[:, C:2 * C].astype(bf16)
    wv = wqkv[:, 2 * C:].astype(bf16)
    bq = bqkv[:, :C] * scale
    bk = bqkv[:, C:2 * C]
    bv = bqkv[:, 2 * C:]
    wproj = params["wproj"].astype(bf16)                 # (C, C), rows h-major/d-minor
    wfc1 = params["wfc1"].astype(bf16)                   # (C, H)
    wfc2 = params["wfc2"].astype(bf16)                   # (H, C)

    tr = _seq_tile(N, max_tile)
    nr = N // tr

    # ---- kernel 1: LN1 + QKV ----
    # TODO(synk): mark the weight BlockSpecs pipeline_mode=pl.Buffered(1) (no
    # double-buffering of constant blocks) once verified on the target JAX build.
    q, k, v = pl.pallas_call(
        _ln_qkv_kernel,
        out_shape=(jax.ShapeDtypeStruct((B, N, C), bf16),
                   jax.ShapeDtypeStruct((B, N, C), bf16),
                   jax.ShapeDtypeStruct((B, N, C), bf16)),
        grid_spec=pltpu.PrefetchScalarGridSpec(
            num_scalar_prefetch=0,
            grid=(B, nr),
            in_specs=[
                pl.BlockSpec((1, tr, C), lambda b, r: (b, r, 0)),    # x
                pl.BlockSpec((1, C), lambda b, r: (0, 0)),           # g1
                pl.BlockSpec((1, C), lambda b, r: (0, 0)),           # b1
                pl.BlockSpec((C, C), lambda b, r: (0, 0)),           # Wq (scaled)
                pl.BlockSpec((C, C), lambda b, r: (0, 0)),           # Wk
                pl.BlockSpec((C, C), lambda b, r: (0, 0)),           # Wv
                pl.BlockSpec((1, C), lambda b, r: (0, 0)),           # bq (scaled)
                pl.BlockSpec((1, C), lambda b, r: (0, 0)),           # bk
                pl.BlockSpec((1, C), lambda b, r: (0, 0)),           # bv
            ],
            out_specs=[
                pl.BlockSpec((1, tr, C), lambda b, r: (b, r, 0)),
                pl.BlockSpec((1, tr, C), lambda b, r: (b, r, 0)),
                pl.BlockSpec((1, tr, C), lambda b, r: (b, r, 0)),
            ],
        ),
        compiler_params=pltpu.CompilerParams(
            dimension_semantics=("parallel", "parallel"),
            vmem_limit_bytes=vmem_limit),
        cost_estimate=pl.CostEstimate(
            flops=2 * B * N * C * 3 * C,
            transcendentals=B * N,
            bytes_accessed=B * N * C * 4 + 3 * B * N * C * 2
                           + 3 * C * C * 2 + 8 * C * 4),
    )(x, params["g1"], params["b1"], wq, wk, wv, bq, bk, bv)

    # ---- kernel 2: attention + proj + residual + LN2 + MLP + residual ----
    # TODO(synk): for long sequences, tile the KV axis (flash-style online
    # softmax with a third "arbitrary" grid axis) instead of keeping full K/V
    # resident per batch row.
    tq = _seq_tile(N, max_tile)
    nq = N // tq
    kernel2 = functools.partial(_attn_mlp_kernel, num_heads, D, bool(gelu_tanh))

    out = pl.pallas_call(
        kernel2,
        out_shape=jax.ShapeDtypeStruct((B, N, C), x.dtype),
        grid_spec=pltpu.PrefetchScalarGridSpec(
            num_scalar_prefetch=0,
            grid=(B, nq),
            in_specs=[
                pl.BlockSpec((1, tq, C), lambda b, i: (b, i, 0)),    # x
                pl.BlockSpec((1, tq, C), lambda b, i: (b, i, 0)),    # q (tile rows)
                pl.BlockSpec((1, N, C), lambda b, i: (b, 0, 0)),     # k (full seq)
                pl.BlockSpec((1, N, C), lambda b, i: (b, 0, 0)),     # v (full seq)
                pl.BlockSpec((C, C), lambda b, i: (0, 0)),           # Wproj
                pl.BlockSpec((1, C), lambda b, i: (0, 0)),           # bproj
                pl.BlockSpec((1, C), lambda b, i: (0, 0)),           # g2
                pl.BlockSpec((1, C), lambda b, i: (0, 0)),           # b2
                pl.BlockSpec((C, H), lambda b, i: (0, 0)),           # Wfc1
                pl.BlockSpec((1, H), lambda b, i: (0, 0)),           # bfc1
                pl.BlockSpec((H, C), lambda b, i: (0, 0)),           # Wfc2
                pl.BlockSpec((1, C), lambda b, i: (0, 0)),           # bfc2
            ],
            out_specs=pl.BlockSpec((1, tq, C), lambda b, i: (b, i, 0)),
            scratch_shapes=[pltpu.VMEM((tq, C), jnp.float32)],       # ctx (heads packed)
        ),
        compiler_params=pltpu.CompilerParams(
            dimension_semantics=("parallel", "parallel"),
            vmem_limit_bytes=vmem_limit),
        cost_estimate=pl.CostEstimate(
            flops=4 * B * N * N * C + 2 * B * N * C * C + 4 * B * N * C * H,
            transcendentals=B * num_heads * N * N + B * N * H + 2 * B * N,
            bytes_accessed=(2 * B * N * C * 4 + 3 * B * N * C * 2
                            + (C * C + 2 * C * H) * 2 + (4 * C + H) * 4)),
    )(x, q, k, v, wproj, params["bproj"], params["g2"], params["b2"],
      wfc1, params["bfc1"], wfc2, params["bfc2"])
    return out


def reference_block(x, params, num_heads):
    # Pure-JAX f32 reference mirroring the PyTorch forward (eval mode).
    B, N, C = x.shape
    D = C // num_heads
    scale = D ** -0.5

    def ln(z, g, b, eps=1e-5):
        m = jnp.mean(z, axis=-1, keepdims=True)
        v = jnp.mean((z - m) ** 2, axis=-1, keepdims=True)
        return (z - m) / jnp.sqrt(v + eps) * g + b

    xn = ln(x, params["g1"], params["b1"])
    qkv = xn @ params["wqkv"] + params["bqkv"]               # (B, N, 3C)
    qkv = qkv.reshape(B, N, 3, num_heads, D).transpose(2, 0, 3, 1, 4)
    q, k, v = qkv[0], qkv[1], qkv[2]                         # (B, h, N, D)
    attn = jnp.einsum("bhnd,bhmd->bhnm", q, k) * scale
    attn = jax.nn.softmax(attn, axis=-1)
    out = jnp.einsum("bhnm,bhmd->bhnd", attn, v)
    out = out.transpose(0, 2, 1, 3).reshape(B, N, C)
    out = out @ params["wproj"] + params["bproj"]
    x1 = x + out
    xn2 = ln(x1, params["g2"], params["b2"])
    h = jax.nn.gelu(xn2 @ params["wfc1"] + params["bfc1"], approximate=False)
    return x1 + (h @ params["wfc2"] + params["bfc2"])


if __name__ == "__main__":
    B, N, C = 2, 8, 32
    num_heads = 4
    mlp_ratio = 4.0
    H = int(C * mlp_ratio)

    key = jax.random.PRNGKey(0)
    keys = jax.random.split(key, 8)

    # Deterministic synthetic parameters (already transposed to (in, out)).
    params = {
        "g1": jnp.ones((1, C), jnp.float32),
        "b1": jnp.zeros((1, C), jnp.float32),
        "wqkv": 0.05 * jax.random.normal(keys[0], (C, 3 * C), jnp.float32),
        "bqkv": 0.01 * jax.random.normal(keys[1], (1, 3 * C), jnp.float32),
        "wproj": 0.05 * jax.random.normal(keys[2], (C, C), jnp.float32),
        "bproj": 0.01 * jax.random.normal(keys[3], (1, C), jnp.float32),
        "g2": jnp.ones((1, C), jnp.float32),
        "b2": jnp.zeros((1, C), jnp.float32),
        "wfc1": 0.05 * jax.random.normal(keys[4], (C, H), jnp.float32),
        "bfc1": 0.01 * jax.random.normal(keys[5], (1, H), jnp.float32),
        "wfc2": 0.05 * jax.random.normal(keys[6], (H, C), jnp.float32),
        "bfc2": 0.01 * jax.random.normal(keys[7], (1, C), jnp.float32),
    }

    x = jax.random.normal(jax.random.PRNGKey(42), (B, N, C), jnp.float32)

    block_fn = jax.jit(vit_block, static_argnums=(2, 3))
    out = block_fn(x, params, num_heads, False)
    out = jax.block_until_ready(out)

    ref = reference_block(x, params, num_heads)
    assert out.shape == (B, N, C)
    # Tolerance loosened vs. pure-f32: matmul operands are bf16 (f32 accumulate),
    # softmax denominator uses pl.reciprocal(approx=True).
    assert jnp.allclose(out, ref, atol=2e-2, rtol=2e-2), "mismatch vs reference"

    print("KERNEL_OK")
</pallas_src>

<mosaic_0001>
module attributes {stable_mosaic.version = 11 : i64} {
  func.func @_ln_qkv_kernel(%arg0: i32, %arg1: i32, %arg2: memref<1x8x32xf32, #tpu.memory_space<vmem>>, %arg3: memref<1x32xf32, #tpu.memory_space<vmem>>, %arg4: memref<1x32xf32, #tpu.memory_space<vmem>>, %arg5: memref<32x32xbf16, #tpu.memory_space<vmem>>, %arg6: memref<32x32xbf16, #tpu.memory_space<vmem>>, %arg7: memref<32x32xbf16, #tpu.memory_space<vmem>>, %arg8: memref<1x32xf32, #tpu.memory_space<vmem>>, %arg9: memref<1x32xf32, #tpu.memory_space<vmem>>, %arg10: memref<1x32xf32, #tpu.memory_space<vmem>>, %arg11: memref<1x8x32xbf16, #tpu.memory_space<vmem>>, %arg12: memref<1x8x32xbf16, #tpu.memory_space<vmem>>, %arg13: memref<1x8x32xbf16, #tpu.memory_space<vmem>>) attributes {dimension_semantics = [#tpu.dimension_semantics<parallel>, #tpu.dimension_semantics<parallel>], iteration_bounds = array<i64: 2, 1>, scalar_prefetch = 0 : i64, scratch_operands = 0 : i64, tpu.core_type = #tpu.core_type<tc>, window_params = [{transform_indices = @transform_0, window_bounds = array<i64: 1, 8, 32>}, {pipeline_mode = #tpu.pipeline_mode<synchronous>, transform_indices = @transform_1, window_bounds = array<i64: 1, 32>}, {pipeline_mode = #tpu.pipeline_mode<synchronous>, transform_indices = @transform_2, window_bounds = array<i64: 1, 32>}, {pipeline_mode = #tpu.pipeline_mode<synchronous>, transform_indices = @transform_3, window_bounds = array<i64: 32, 32>}, {pipeline_mode = #tpu.pipeline_mode<synchronous>, transform_indices = @transform_4, window_bounds = array<i64: 32, 32>}, {pipeline_mode = #tpu.pipeline_mode<synchronous>, transform_indices = @transform_5, window_bounds = array<i64: 32, 32>}, {pipeline_mode = #tpu.pipeline_mode<synchronous>, transform_indices = @transform_6, window_bounds = array<i64: 1, 32>}, {pipeline_mode = #tpu.pipeline_mode<synchronous>, transform_indices = @transform_7, window_bounds = array<i64: 1, 32>}, {pipeline_mode = #tpu.pipeline_mode<synchronous>, transform_indices = @transform_8, window_bounds = array<i64: 1, 32>}, {transform_indices = @transform_9, window_bounds = array<i64: 1, 8, 32>}, {transform_indices = @transform_10, window_bounds = array<i64: 1, 8, 32>}, {transform_indices = @transform_11, window_bounds = array<i64: 1, 8, 32>}]} {
    %c0 = arith.constant 0 : index
    %c0_0 = arith.constant 0 : index
    %c0_1 = arith.constant 0 : index
    %0 = vector.load %arg2[%c0, %c0_0, %c0_1] : memref<1x8x32xf32, #tpu.memory_space<vmem>>, vector<1x8x32xf32>
    %1 = vector.shape_cast %0 : vector<1x8x32xf32> to vector<8x32xf32>
    %c0_2 = arith.constant 0 : index
    %c0_3 = arith.constant 0 : index
    %2 = vector.load %arg3[%c0_2, %c0_3] : memref<1x32xf32, #tpu.memory_space<vmem>>, vector<1x32xf32>
    %c0_4 = arith.constant 0 : index
    %c0_5 = arith.constant 0 : index
    %3 = vector.load %arg4[%c0_4, %c0_5] : memref<1x32xf32, #tpu.memory_space<vmem>>, vector<1x32xf32>
    %cst = arith.constant dense<0.000000e+00> : vector<8xf32>
    %4 = vector.multi_reduction <add>, %1, %cst [1] : vector<8x32xf32> to vector<8xf32>
    %5 = vector.shape_cast %4 : vector<8xf32> to vector<8x1xf32>
    %cst_6 = arith.constant 3.200000e+01 : f32
    %6 = vector.broadcast %cst_6 : f32 to vector<8x1xf32>
    %7 = arith.divf %5, %6 : vector<8x1xf32>
    %8 = vector.broadcast %7 : vector<8x1xf32> to vector<8x32xf32>
    %9 = arith.subf %1, %8 : vector<8x32xf32>
    %10 = arith.mulf %9, %9 : vector<8x32xf32>
    %cst_7 = arith.constant dense<0.000000e+00> : vector<8xf32>
    %11 = vector.multi_reduction <add>, %10, %cst_7 [1] : vector<8x32xf32> to vector<8xf32>
    %12 = vector.shape_cast %11 : vector<8xf32> to vector<8x1xf32>
    %cst_8 = arith.constant 3.200000e+01 : f32
    %13 = vector.broadcast %cst_8 : f32 to vector<8x1xf32>
    %14 = arith.divf %12, %13 : vector<8x1xf32>
    %cst_9 = arith.constant 9.99999974E-6 : f32
    %15 = vector.broadcast %cst_9 : f32 to vector<8x1xf32>
    %16 = arith.addf %14, %15 : vector<8x1xf32>
    %17 = math.rsqrt %16 : vector<8x1xf32>
    %18 = vector.broadcast %17 : vector<8x1xf32> to vector<8x32xf32>
    %19 = arith.mulf %9, %18 : vector<8x32xf32>
    %20 = vector.broadcast %2 : vector<1x32xf32> to vector<8x32xf32>
    %21 = arith.mulf %19, %20 : vector<8x32xf32>
    %22 = vector.broadcast %3 : vector<1x32xf32> to vector<8x32xf32>
    %23 = arith.addf %21, %22 : vector<8x32xf32>
    %24 = arith.truncf %23 : vector<8x32xf32> to vector<8x32xbf16>
    %c0_10 = arith.constant 0 : index
    %c0_11 = arith.constant 0 : index
    %25 = vector.load %arg5[%c0_10, %c0_11] : memref<32x32xbf16, #tpu.memory_space<vmem>>, vector<32x32xbf16>
    %cst_12 = arith.constant dense<0.000000e+00> : vector<8x32xf32>
    %26 = tpu.matmul %24, %25, %cst_12 {dimension_numbers = #tpu.dot_dimension_numbers<[1], [0], [0], [1], [0, 0, 1, 1], [], []>} : vector<8x32xbf16>, vector<32x32xbf16>, vector<8x32xf32> -> vector<8x32xf32>
    %c0_13 = arith.constant 0 : index
    %c0_14 = arith.constant 0 : index
    %27 = vector.load %arg8[%c0_13, %c0_14] : memref<1x32xf32, #tpu.memory_space<vmem>>, vector<1x32xf32>
    %28 = vector.broadcast %27 : vector<1x32xf32> to vector<8x32xf32>
    %29 = arith.addf %26, %28 : vector<8x32xf32>
    %c0_15 = arith.constant 0 : index
    %c0_16 = arith.constant 0 : index
    %30 = vector.load %arg6[%c0_15, %c0_16] : memref<32x32xbf16, #tpu.memory_space<vmem>>, vector<32x32xbf16>
    %cst_17 = arith.constant dense<0.000000e+00> : vector<8x32xf32>
    %31 = tpu.matmul %24, %30, %cst_17 {dimension_numbers = #tpu.dot_dimension_numbers<[1], [0], [0], [1], [0, 0, 1, 1], [], []>} : vector<8x32xbf16>, vector<32x32xbf16>, vector<8x32xf32> -> vector<8x32xf32>
    %c0_18 = arith.constant 0 : index
    %c0_19 = arith.constant 0 : index
    %32 = vector.load %arg9[%c0_18, %c0_19] : memref<1x32xf32, #tpu.memory_space<vmem>>, vector<1x32xf32>
    %33 = vector.broadcast %32 : vector<1x32xf32> to vector<8x32xf32>
    %34 = arith.addf %31, %33 : vector<8x32xf32>
    %c0_20 = arith.constant 0 : index
    %c0_21 = arith.constant 0 : index
    %35 = vector.load %arg7[%c0_20, %c0_21] : memref<32x32xbf16, #tpu.memory_space<vmem>>, vector<32x32xbf16>
    %cst_22 = arith.constant dense<0.000000e+00> : vector<8x32xf32>
    %36 = tpu.matmul %24, %35, %cst_22 {dimension_numbers = #tpu.dot_dimension_numbers<[1], [0], [0], [1], [0, 0, 1, 1], [], []>} : vector<8x32xbf16>, vector<32x32xbf16>, vector<8x32xf32> -> vector<8x32xf32>
    %c0_23 = arith.constant 0 : index
    %c0_24 = arith.constant 0 : index
    %37 = vector.load %arg10[%c0_23, %c0_24] : memref<1x32xf32, #tpu.memory_space<vmem>>, vector<1x32xf32>
    %38 = vector.broadcast %37 : vector<1x32xf32> to vector<8x32xf32>
    %39 = arith.addf %36, %38 : vector<8x32xf32>
    %40 = arith.truncf %29 : vector<8x32xf32> to vector<8x32xbf16>
    %c0_25 = arith.constant 0 : index
    %c0_26 = arith.constant 0 : index
    %c0_27 = arith.constant 0 : index
    %41 = vector.load %arg11[%c0_25, %c0_26, %c0_27] : memref<1x8x32xbf16, #tpu.memory_space<vmem>>, vector<1x8x32xbf16>
    %42 = vector.shape_cast %41 : vector<1x8x32xbf16> to vector<8x32xbf16>
    %43 = vector.shape_cast %40 : vector<8x32xbf16> to vector<1x8x32xbf16>
    tpu.vector_store %arg11[%c0_25, %c0_26, %c0_27], %43 {strides = array<i32>} : memref<1x8x32xbf16, #tpu.memory_space<vmem>>, vector<1x8x32xbf16>,
    %44 = arith.truncf %34 : vector<8x32xf32> to vector<8x32xbf16>
    %c0_28 = arith.constant 0 : index
    %c0_29 = arith.constant 0 : index
    %c0_30 = arith.constant 0 : index
    %45 = vector.load %arg12[%c0_28, %c0_29, %c0_30] : memref<1x8x32xbf16, #tpu.memory_space<vmem>>, vector<1x8x32xbf16>
    %46 = vector.shape_cast %45 : vector<1x8x32xbf16> to vector<8x32xbf16>
    %47 = vector.shape_cast %44 : vector<8x32xbf16> to vector<1x8x32xbf16>
    tpu.vector_store %arg12[%c0_28, %c0_29, %c0_30], %47 {strides = array<i32>} : memref<1x8x32xbf16, #tpu.memory_space<vmem>>, vector<1x8x32xbf16>,
    %48 = arith.truncf %39 : vector<8x32xf32> to vector<8x32xbf16>
    %c0_31 = arith.constant 0 : index
    %c0_32 = arith.constant 0 : index
    %c0_33 = arith.constant 0 : index
    %49 = vector.load %arg13[%c0_31, %c0_32, %c0_33] : memref<1x8x32xbf16, #tpu.memory_space<vmem>>, vector<1x8x32xbf16>
    %50 = vector.shape_cast %49 : vector<1x8x32xbf16> to vector<8x32xbf16>
    %51 = vector.shape_cast %48 : vector<8x32xbf16> to vector<1x8x32xbf16>
    tpu.vector_store %arg13[%c0_31, %c0_32, %c0_33], %51 {strides = array<i32>} : memref<1x8x32xbf16, #tpu.memory_space<vmem>>, vector<1x8x32xbf16>,
    return
  }
  func.func @transform_0(%arg0: i32, %arg1: i32) -> (i32, i32, i32) {
    %c0_i32 = arith.constant 0 : i32
    %c0_i32_0 = arith.constant 0 : i32
    return %arg0, %arg1, %c0_i32 : i32, i32, i32
  }
  func.func @transform_1(%arg0: i32, %arg1: i32) -> (i32, i32) {
    %c0_i32 = arith.constant 0 : i32
    %c0_i32_0 = arith.constant 0 : i32
    %c0_i32_1 = arith.constant 0 : i32
    return %c0_i32, %c0_i32_0 : i32, i32
  }
  func.func @transform_2(%arg0: i32, %arg1: i32) -> (i32, i32) {
    %c0_i32 = arith.constant 0 : i32
    %c0_i32_0 = arith.constant 0 : i32
    %c0_i32_1 = arith.constant 0 : i32
    return %c0_i32, %c0_i32_0 : i32, i32
  }
  func.func @transform_3(%arg0: i32, %arg1: i32) -> (i32, i32) {
    %c0_i32 = arith.constant 0 : i32
    %c0_i32_0 = arith.constant 0 : i32
    %c0_i32_1 = arith.constant 0 : i32
    return %c0_i32, %c0_i32_0 : i32, i32
  }
  func.func @transform_4(%arg0: i32, %arg1: i32) -> (i32, i32) {
    %c0_i32 = arith.constant 0 : i32
    %c0_i32_0 = arith.constant 0 : i32
    %c0_i32_1 = arith.constant 0 : i32
    return %c0_i32, %c0_i32_0 : i32, i32
  }
  func.func @transform_5(%arg0: i32, %arg1: i32) -> (i32, i32) {
    %c0_i32 = arith.constant 0 : i32
    %c0_i32_0 = arith.constant 0 : i32
    %c0_i32_1 = arith.constant 0 : i32
    return %c0_i32, %c0_i32_0 : i32, i32
  }
  func.func @transform_6(%arg0: i32, %arg1: i32) -> (i32, i32) {
    %c0_i32 = arith.constant 0 : i32
    %c0_i32_0 = arith.constant 0 : i32
    %c0_i32_1 = arith.constant 0 : i32
    return %c0_i32, %c0_i32_0 : i32, i32
  }
  func.func @transform_7(%arg0: i32, %arg1: i32) -> (i32, i32) {
    %c0_i32 = arith.constant 0 : i32
    %c0_i32_0 = arith.constant 0 : i32
    %c0_i32_1 = arith.constant 0 : i32
    return %c0_i32, %c0_i32_0 : i32, i32
  }
  func.func @transform_8(%arg0: i32, %arg1: i32) -> (i32, i32) {
    %c0_i32 = arith.constant 0 : i32
    %c0_i32_0 = arith.constant 0 : i32
    %c0_i32_1 = arith.constant 0 : i32
    return %c0_i32, %c0_i32_0 : i32, i32
  }
  func.func @transform_9(%arg0: i32, %arg1: i32) -> (i32, i32, i32) {
    %c0_i32 = arith.constant 0 : i32
    %c0_i32_0 = arith.constant 0 : i32
    return %arg0, %arg1, %c0_i32 : i32, i32, i32
  }
  func.func @transform_10(%arg0: i32, %arg1: i32) -> (i32, i32, i32) {
    %c0_i32 = arith.constant 0 : i32
    %c0_i32_0 = arith.constant 0 : i32
    return %arg0, %arg1, %c0_i32 : i32, i32, i32
  }
  func.func @transform_11(%arg0: i32, %arg1: i32) -> (i32, i32, i32) {
    %c0_i32 = arith.constant 0 : i32
    %c0_i32_0 = arith.constant 0 : i32
    return %arg0, %arg1, %c0_i32 : i32, i32, i32
  }
}

module attributes {stable_mosaic.version = 11 : i64} {
  func.func @_attn_mlp_kernel(%arg0: i32, %arg1: i32, %arg2: memref<1x8x32xf32, #tpu.memory_space<vmem>>, %arg3: memref<1x8x32xbf16, #tpu.memory_space<vmem>>, %arg4: memref<1x8x32xbf16, #tpu.memory_space<vmem>>, %arg5: memref<1x8x32xbf16, #tpu.memory_space<vmem>>, %arg6: memref<32x32xbf16, #tpu.memory_space<vmem>>, %arg7: memref<1x32xf32, #tpu.memory_space<vmem>>, %arg8: memref<1x32xf32, #tpu.memory_space<vmem>>, %arg9: memref<1x32xf32, #tpu.memory_space<vmem>>, %arg10: memref<32x128xbf16, #tpu.memory_space<vmem>>, %arg11: memref<1x128xf32, #tpu.memory_space<vmem>>, %arg12: memref<128x32xbf16, #tpu.memory_space<vmem>>, %arg13: memref<1x32xf32, #tpu.memory_space<vmem>>, %arg14: memref<1x8x32xf32, #tpu.memory_space<vmem>>, %arg15: memref<8x32xf32, #tpu.memory_space<vmem>>) attributes {dimension_semantics = [#tpu.dimension_semantics<parallel>, #tpu.dimension_semantics<parallel>], iteration_bounds = array<i64: 2, 1>, scalar_prefetch = 0 : i64, scratch_operands = 1 : i64, tpu.core_type = #tpu.core_type<tc>, window_params = [{transform_indices = @transform_0, window_bounds = array<i64: 1, 8, 32>}, {transform_indices = @transform_1, window_bounds = array<i64: 1, 8, 32>}, {transform_indices = @transform_2, window_bounds = array<i64: 1, 8, 32>}, {transform_indices = @transform_3, window_bounds = array<i64: 1, 8, 32>}, {pipeline_mode = #tpu.pipeline_mode<synchronous>, transform_indices = @transform_4, window_bounds = array<i64: 32, 32>}, {pipeline_mode = #tpu.pipeline_mode<synchronous>, transform_indices = @transform_5, window_bounds = array<i64: 1, 32>}, {pipeline_mode = #tpu.pipeline_mode<synchronous>, transform_indices = @transform_6, window_bounds = array<i64: 1, 32>}, {pipeline_mode = #tpu.pipeline_mode<synchronous>, transform_indices = @transform_7, window_bounds = array<i64: 1, 32>}, {pipeline_mode = #tpu.pipeline_mode<synchronous>, transform_indices = @transform_8, window_bounds = array<i64: 32, 128>}, {pipeline_mode = #tpu.pipeline_mode<synchronous>, transform_indices = @transform_9, window_bounds = array<i64: 1, 128>}, {pipeline_mode = #tpu.pipeline_mode<synchronous>, transform_indices = @transform_10, window_bounds = array<i64: 128, 32>}, {pipeline_mode = #tpu.pipeline_mode<synchronous>, transform_indices = @transform_11, window_bounds = array<i64: 1, 32>}, {transform_indices = @transform_12, window_bounds = array<i64: 1, 8, 32>}]} {
    %c0 = arith.constant 0 : index
    %c0_0 = arith.constant 0 : index
    %c0_1 = arith.constant 0 : index
    %0 = vector.load %arg2[%c0, %c0_0, %c0_1] : memref<1x8x32xf32, #tpu.memory_space<vmem>>, vector<1x8x32xf32>
    %1 = vector.shape_cast %0 : vector<1x8x32xf32> to vector<8x32xf32>
    %c0_2 = arith.constant 0 : index
    %c0_3 = arith.constant 0 : index
    %c0_4 = arith.constant 0 : index
    %2 = vector.load %arg3[%c0_2, %c0_3, %c0_4] : memref<1x8x32xbf16, #tpu.memory_space<vmem>>, vector<1x8x32xbf16>
    %3 = vector.shape_cast %2 : vector<1x8x32xbf16> to vector<8x32xbf16>
    %c0_5 = arith.constant 0 : index
    %c0_6 = arith.constant 0 : index
    %c0_7 = arith.constant 0 : index
    %4 = vector.load %arg4[%c0_5, %c0_6, %c0_7] : memref<1x8x32xbf16, #tpu.memory_space<vmem>>, vector<1x8x32xbf16>
    %5 = vector.shape_cast %4 : vector<1x8x32xbf16> to vector<8x32xbf16>
    %c0_8 = arith.constant 0 : index
    %c0_9 = arith.constant 0 : index
    %c0_10 = arith.constant 0 : index
    %6 = vector.load %arg5[%c0_8, %c0_9, %c0_10] : memref<1x8x32xbf16, #tpu.memory_space<vmem>>, vector<1x8x32xbf16>
    %7 = vector.shape_cast %6 : vector<1x8x32xbf16> to vector<8x32xbf16>
    %8 = vector.extract_strided_slice %3 {offsets = [0, 0], sizes = [8, 8], strides = [1, 1]} : vector<8x32xbf16> to vector<8x8xbf16>
    %9 = vector.extract_strided_slice %5 {offsets = [0, 0], sizes = [8, 8], strides = [1, 1]} : vector<8x32xbf16> to vector<8x8xbf16>
    %10 = vector.extract_strided_slice %7 {offsets = [0, 0], sizes = [8, 8], strides = [1, 1]} : vector<8x32xbf16> to vector<8x8xbf16>
    "tpu.trace_start"() <{level = 10 : i32, message = "qd,kd->qk"}> : () -> ()
    %cst = arith.constant dense<0.000000e+00> : vector<8x8xf32>
    %11 = tpu.matmul %8, %9, %cst {dimension_numbers = #tpu.dot_dimension_numbers<[1], [1], [0], [0], [0, 0, 1, 0], [], []>} : vector<8x8xbf16>, vector<8x8xbf16>, vector<8x8xf32> -> vector<8x8xf32>
    "tpu.trace_stop"() : () -> ()
    %cst_11 = arith.constant dense<0xFF800000> : vector<8xf32>
    %12 = vector.multi_reduction <maximumf>, %11, %cst_11 [1] : vector<8x8xf32> to vector<8xf32>
    %13 = vector.shape_cast %12 : vector<8xf32> to vector<8x1xf32>
    %14 = vector.broadcast %13 : vector<8x1xf32> to vector<8x8xf32>
    %15 = arith.subf %11, %14 : vector<8x8xf32>
    %16 = math.exp %15 : vector<8x8xf32>
    %cst_12 = arith.constant dense<0.000000e+00> : vector<8xf32>
    %17 = vector.multi_reduction <add>, %16, %cst_12 [1] : vector<8x8xf32> to vector<8xf32>
    %18 = vector.shape_cast %17 : vector<8xf32> to vector<8x1xf32>
    %19 = arith.truncf %16 : vector<8x8xf32> to vector<8x8xbf16>
    %cst_13 = arith.constant dense<0.000000e+00> : vector<8x8xf32>
    %20 = tpu.matmul %19, %10, %cst_13 {dimension_numbers = #tpu.dot_dimension_numbers<[1], [0], [0], [1], [0, 0, 1, 1], [], []>} : vector<8x8xbf16>, vector<8x8xbf16>, vector<8x8xf32> -> vector<8x8xf32>
    %21 = tpu.reciprocal %18 {approx = true} : vector<8x1xf32> -> vector<8x1xf32>
    %22 = vector.broadcast %21 : vector<8x1xf32> to vector<8x8xf32>
    %23 = arith.mulf %20, %22 : vector<8x8xf32>
    %c0_14 = arith.constant 0 : index
    %c0_15 = arith.constant 0 : index
    %24 = vector.load %arg15[%c0_14, %c0_15] : memref<8x32xf32, #tpu.memory_space<vmem>>, vector<8x8xf32>
    tpu.vector_store %arg15[%c0_14, %c0_15], %23 {strides = array<i32>} : memref<8x32xf32, #tpu.memory_space<vmem>>, vector<8x8xf32>,
    %25 = vector.extract_strided_slice %3 {offsets = [0, 8], sizes = [8, 8], strides = [1, 1]} : vector<8x32xbf16> to vector<8x8xbf16>
    %26 = vector.extract_strided_slice %5 {offsets = [0, 8], sizes = [8, 8], strides = [1, 1]} : vector<8x32xbf16> to vector<8x8xbf16>
    %27 = vector.extract_strided_slice %7 {offsets = [0, 8], sizes = [8, 8], strides = [1, 1]} : vector<8x32xbf16> to vector<8x8xbf16>
    "tpu.trace_start"() <{level = 10 : i32, message = "qd,kd->qk"}> : () -> ()
    %cst_16 = arith.constant dense<0.000000e+00> : vector<8x8xf32>
    %28 = tpu.matmul %25, %26, %cst_16 {dimension_numbers = #tpu.dot_dimension_numbers<[1], [1], [0], [0], [0, 0, 1, 0], [], []>} : vector<8x8xbf16>, vector<8x8xbf16>, vector<8x8xf32> -> vector<8x8xf32>
    "tpu.trace_stop"() : () -> ()
    %cst_17 = arith.constant dense<0xFF800000> : vector<8xf32>
    %29 = vector.multi_reduction <maximumf>, %28, %cst_17 [1] : vector<8x8xf32> to vector<8xf32>
    %30 = vector.shape_cast %29 : vector<8xf32> to vector<8x1xf32>
    %31 = vector.broadcast %30 : vector<8x1xf32> to vector<8x8xf32>
    %32 = arith.subf %28, %31 : vector<8x8xf32>
    %33 = math.exp %32 : vector<8x8xf32>
    %cst_18 = arith.constant dense<0.000000e+00> : vector<8xf32>
    %34 = vector.multi_reduction <add>, %33, %cst_18 [1] : vector<8x8xf32> to vector<8xf32>
    %35 = vector.shape_cast %34 : vector<8xf32> to vector<8x1xf32>
    %36 = arith.truncf %33 : vector<8x8xf32> to vector<8x8xbf16>
    %cst_19 = arith.constant dense<0.000000e+00> : vector<8x8xf32>
    %37 = tpu.matmul %36, %27, %cst_19 {dimension_numbers = #tpu.dot_dimension_numbers<[1], [0], [0], [1], [0, 0, 1, 1], [], []>} : vector<8x8xbf16>, vector<8x8xbf16>, vector<8x8xf32> -> vector<8x8xf32>
    %38 = tpu.reciprocal %35 {approx = true} : vector<8x1xf32> -> vector<8x1xf32>
    %39 = vector.broadcast %38 : vector<8x1xf32> to vector<8x8xf32>
    %40 = arith.mulf %37, %39 : vector<8x8xf32>
    %c0_20 = arith.constant 0 : index
    %c8 = arith.constant 8 : index
    %41 = vector.load %arg15[%c0_20, %c8] : memref<8x32xf32, #tpu.memory_space<vmem>>, vector<8x8xf32>
    tpu.vector_store %arg15[%c0_20, %c8], %40 {strides = array<i32>} : memref<8x32xf32, #tpu.memory_space<vmem>>, vector<8x8xf32>,
    %42 = vector.extract_strided_slice %3 {offsets = [0, 16], sizes = [8, 8], strides = [1, 1]} : vector<8x32xbf16> to vector<8x8xbf16>
    %43 = vector.extract_strided_slice %5 {offsets = [0, 16], sizes = [8, 8], strides = [1, 1]} : vector<8x32xbf16> to vector<8x8xbf16>
    %44 = vector.extract_strided_slice %7 {offsets = [0, 16], sizes = [8, 8], strides = [1, 1]} : vector<8x32xbf16> to vector<8x8xbf16>
    "tpu.trace_start"() <{level = 10 : i32, message = "qd,kd->qk"}> : () -> ()
    %cst_21 = arith.constant dense<0.000000e+00> : vector<8x8xf32>
    %45 = tpu.matmul %42, %43, %cst_21 {dimension_numbers = #tpu.dot_dimension_numbers<[1], [1], [0], [0], [0, 0, 1, 0], [], []>} : vector<8x8xbf16>, vector<8x8xbf16>, vector<8x8xf32> -> vector<8x8xf32>
    "tpu.trace_stop"() : () -> ()
    %cst_22 = arith.constant dense<0xFF800000> : vector<8xf32>
    %46 = vector.multi_reduction <maximumf>, %45, %cst_22 [1] : vector<8x8xf32> to vector<8xf32>
    %47 = vector.shape_cast %46 : vector<8xf32> to vector<8x1xf32>
    %48 = vector.broadcast %47 : vector<8x1xf32> to vector<8x8xf32>
    %49 = arith.subf %45, %48 : vector<8x8xf32>
    %50 = math.exp %49 : vector<8x8xf32>
    %cst_23 = arith.constant dense<0.000000e+00> : vector<8xf32>
    %51 = vector.multi_reduction <add>, %50, %cst_23 [1] : vector<8x8xf32> to vector<8xf32>
    %52 = vector.shape_cast %51 : vector<8xf32> to vector<8x1xf32>
    %53 = arith.truncf %50 : vector<8x8xf32> to vector<8x8xbf16>
    %cst_24 = arith.constant dense<0.000000e+00> : vector<8x8xf32>
    %54 = tpu.matmul %53, %44, %cst_24 {dimension_numbers = #tpu.dot_dimension_numbers<[1], [0], [0], [1], [0, 0, 1, 1], [], []>} : vector<8x8xbf16>, vector<8x8xbf16>, vector<8x8xf32> -> vector<8x8xf32>
    %55 = tpu.reciprocal %52 {approx = true} : vector<8x1xf32> -> vector<8x1xf32>
    %56 = vector.broadcast %55 : vector<8x1xf32> to vector<8x8xf32>
    %57 = arith.mulf %54, %56 : vector<8x8xf32>
    %c0_25 = arith.constant 0 : index
    %c16 = arith.constant 16 : index
    %58 = vector.load %arg15[%c0_25, %c16] : memref<8x32xf32, #tpu.memory_space<vmem>>, vector<8x8xf32>
    tpu.vector_store %arg15[%c0_25, %c16], %57 {strides = array<i32>} : memref<8x32xf32, #tpu.memory_space<vmem>>, vector<8x8xf32>,
    %59 = vector.extract_strided_slice %3 {offsets = [0, 24], sizes = [8, 8], strides = [1, 1]} : vector<8x32xbf16> to vector<8x8xbf16>
    %60 = vector.extract_strided_slice %5 {offsets = [0, 24], sizes = [8, 8], strides = [1, 1]} : vector<8x32xbf16> to vector<8x8xbf16>
    %61 = vector.extract_strided_slice %7 {offsets = [0, 24], sizes = [8, 8], strides = [1, 1]} : vector<8x32xbf16> to vector<8x8xbf16>
    "tpu.trace_start"() <{level = 10 : i32, message = "qd,kd->qk"}> : () -> ()
    %cst_26 = arith.constant dense<0.000000e+00> : vector<8x8xf32>
    %62 = tpu.matmul %59, %60, %cst_26 {dimension_numbers = #tpu.dot_dimension_numbers<[1], [1], [0], [0], [0, 0, 1, 0], [], []>} : vector<8x8xbf16>, vector<8x8xbf16>, vector<8x8xf32> -> vector<8x8xf32>
    "tpu.trace_stop"() : () -> ()
    %cst_27 = arith.constant dense<0xFF800000> : vector<8xf32>
    %63 = vector.multi_reduction <maximumf>, %62, %cst_27 [1] : vector<8x8xf32> to vector<8xf32>
    %64 = vector.shape_cast %63 : vector<8xf32> to vector<8x1xf32>
    %65 = vector.broadcast %64 : vector<8x1xf32> to vector<8x8xf32>
    %66 = arith.subf %62, %65 : vector<8x8xf32>
    %67 = math.exp %66 : vector<8x8xf32>
    %cst_28 = arith.constant dense<0.000000e+00> : vector<8xf32>
    %68 = vector.multi_reduction <add>, %67, %cst_28 [1] : vector<8x8xf32> to vector<8xf32>
    %69 = vector.shape_cast %68 : vector<8xf32> to vector<8x1xf32>
    %70 = arith.truncf %67 : vector<8x8xf32> to vector<8x8xbf16>
    %cst_29 = arith.constant dense<0.000000e+00> : vector<8x8xf32>
    %71 = tpu.matmul %70, %61, %cst_29 {dimension_numbers = #tpu.dot_dimension_numbers<[1], [0], [0], [1], [0, 0, 1, 1], [], []>} : vector<8x8xbf16>, vector<8x8xbf16>, vector<8x8xf32> -> vector<8x8xf32>
    %72 = tpu.reciprocal %69 {approx = true} : vector<8x1xf32> -> vector<8x1xf32>
    %73 = vector.broadcast %72 : vector<8x1xf32> to vector<8x8xf32>
    %74 = arith.mulf %71, %73 : vector<8x8xf32>
    %c0_30 = arith.constant 0 : index
    %c24 = arith.constant 24 : index
    %75 = vector.load %arg15[%c0_30, %c24] : memref<8x32xf32, #tpu.memory_space<vmem>>, vector<8x8xf32>
    tpu.vector_store %arg15[%c0_30, %c24], %74 {strides = array<i32>} : memref<8x32xf32, #tpu.memory_space<vmem>>, vector<8x8xf32>,
    %c0_31 = arith.constant 0 : index
    %c0_32 = arith.constant 0 : index
    %76 = vector.load %arg15[%c0_31, %c0_32] : memref<8x32xf32, #tpu.memory_space<vmem>>, vector<8x32xf32>
    %77 = arith.truncf %76 : vector<8x32xf32> to vector<8x32xbf16>
    %c0_33 = arith.constant 0 : index
    %c0_34 = arith.constant 0 : index
    %78 = vector.load %arg6[%c0_33, %c0_34] : memref<32x32xbf16, #tpu.memory_space<vmem>>, vector<32x32xbf16>
    %cst_35 = arith.constant dense<0.000000e+00> : vector<8x32xf32>
    %79 = tpu.matmul %77, %78, %cst_35 {dimension_numbers = #tpu.dot_dimension_numbers<[1], [0], [0], [1], [0, 0, 1, 1], [], []>} : vector<8x32xbf16>, vector<32x32xbf16>, vector<8x32xf32> -> vector<8x32xf32>
    %c0_36 = arith.constant 0 : index
    %c0_37 = arith.constant 0 : index
    %80 = vector.load %arg7[%c0_36, %c0_37] : memref<1x32xf32, #tpu.memory_space<vmem>>, vector<1x32xf32>
    %81 = vector.broadcast %80 : vector<1x32xf32> to vector<8x32xf32>
    %82 = arith.addf %79, %81 : vector<8x32xf32>
    %83 = arith.addf %1, %82 : vector<8x32xf32>
    %c0_38 = arith.constant 0 : index
    %c0_39 = arith.constant 0 : index
    %84 = vector.load %arg8[%c0_38, %c0_39] : memref<1x32xf32, #tpu.memory_space<vmem>>, vector<1x32xf32>
    %c0_40 = arith.constant 0 : index
    %c0_41 = arith.constant 0 : index
    %85 = vector.load %arg9[%c0_40, %c0_41] : memref<1x32xf32, #tpu.memory_space<vmem>>, vector<1x32xf32>
    %cst_42 = arith.constant dense<0.000000e+00> : vector<8xf32>
    %86 = vector.multi_reduction <add>, %83, %cst_42 [1] : vector<8x32xf32> to vector<8xf32>
    %87 = vector.shape_cast %86 : vector<8xf32> to vector<8x1xf32>
    %cst_43 = arith.constant 3.200000e+01 : f32
    %88 = vector.broadcast %cst_43 : f32 to vector<8x1xf32>
    %89 = arith.divf %87, %88 : vector<8x1xf32>
    %90 = vector.broadcast %89 : vector<8x1xf32> to vector<8x32xf32>
    %91 = arith.subf %83, %90 : vector<8x32xf32>
    %92 = arith.mulf %91, %91 : vector<8x32xf32>
    %cst_44 = arith.constant dense<0.000000e+00> : vector<8xf32>
    %93 = vector.multi_reduction <add>, %92, %cst_44 [1] : vector<8x32xf32> to vector<8xf32>
    %94 = vector.shape_cast %93 : vector<8xf32> to vector<8x1xf32>
    %cst_45 = arith.constant 3.200000e+01 : f32
    %95 = vector.broadcast %cst_45 : f32 to vector<8x1xf32>
    %96 = arith.divf %94, %95 : vector<8x1xf32>
    %cst_46 = arith.constant 9.99999974E-6 : f32
    %97 = vector.broadcast %cst_46 : f32 to vector<8x1xf32>
    %98 = arith.addf %96, %97 : vector<8x1xf32>
    %99 = math.rsqrt %98 : vector<8x1xf32>
    %100 = vector.broadcast %99 : vector<8x1xf32> to vector<8x32xf32>
    %101 = arith.mulf %91, %100 : vector<8x32xf32>
    %102 = vector.broadcast %84 : vector<1x32xf32> to vector<8x32xf32>
    %103 = arith.mulf %101, %102 : vector<8x32xf32>
    %104 = vector.broadcast %85 : vector<1x32xf32> to vector<8x32xf32>
    %105 = arith.addf %103, %104 : vector<8x32xf32>
    %106 = arith.truncf %105 : vector<8x32xf32> to vector<8x32xbf16>
    %c0_47 = arith.constant 0 : index
    %c0_48 = arith.constant 0 : index
    %107 = vector.load %arg10[%c0_47, %c0_48] : memref<32x128xbf16, #tpu.memory_space<vmem>>, vector<32x128xbf16>
    %cst_49 = arith.constant dense<0.000000e+00> : vector<8x128xf32>
    %108 = tpu.matmul %106, %107, %cst_49 {dimension_numbers = #tpu.dot_dimension_numbers<[1], [0], [0], [1], [0, 0, 1, 1], [], []>} : vector<8x32xbf16>, vector<32x128xbf16>, vector<8x128xf32> -> vector<8x128xf32>
    %c0_50 = arith.constant 0 : index
    %c0_51 = arith.constant 0 : index
    %109 = vector.load %arg11[%c0_50, %c0_51] : memref<1x128xf32, #tpu.memory_space<vmem>>, vector<1x128xf32>
    %110 = vector.broadcast %109 : vector<1x128xf32> to vector<8x128xf32>
    %111 = arith.addf %108, %110 : vector<8x128xf32>
    %cst_52 = arith.constant 5.000000e-01 : f32
    %112 = vector.broadcast %cst_52 : f32 to vector<8x128xf32>
    %113 = arith.mulf %112, %111 : vector<8x128xf32>
    %cst_53 = arith.constant 0.707106769 : f32
    %114 = vector.broadcast %cst_53 : f32 to vector<8x128xf32>
    %115 = arith.mulf %111, %114 : vector<8x128xf32>
    %116 = math.erf %115 : vector<8x128xf32>
    %cst_54 = arith.constant 1.000000e+00 : f32
    %117 = vector.broadcast %cst_54 : f32 to vector<8x128xf32>
    %118 = arith.addf %117, %116 : vector<8x128xf32>
    %119 = arith.mulf %113, %118 : vector<8x128xf32>
    %120 = arith.truncf %119 : vector<8x128xf32> to vector<8x128xbf16>
    %c0_55 = arith.constant 0 : index
    %c0_56 = arith.constant 0 : index
    %121 = vector.load %arg12[%c0_55, %c0_56] : memref<128x32xbf16, #tpu.memory_space<vmem>>, vector<128x32xbf16>
    %cst_57 = arith.constant dense<0.000000e+00> : vector<8x32xf32>
    %122 = tpu.matmul %120, %121, %cst_57 {dimension_numbers = #tpu.dot_dimension_numbers<[1], [0], [0], [1], [0, 0, 1, 1], [], []>} : vector<8x128xbf16>, vector<128x32xbf16>, vector<8x32xf32> -> vector<8x32xf32>
    %c0_58 = arith.constant 0 : index
    %c0_59 = arith.constant 0 : index
    %123 = vector.load %arg13[%c0_58, %c0_59] : memref<1x32xf32, #tpu.memory_space<vmem>>, vector<1x32xf32>
    %124 = vector.broadcast %123 : vector<1x32xf32> to vector<8x32xf32>
    %125 = arith.addf %122, %124 : vector<8x32xf32>
    %126 = arith.addf %83, %125 : vector<8x32xf32>
    %c0_60 = arith.constant 0 : index
    %c0_61 = arith.constant 0 : index
    %c0_62 = arith.constant 0 : index
    %127 = vector.load %arg14[%c0_60, %c0_61, %c0_62] : memref<1x8x32xf32, #tpu.memory_space<vmem>>, vector<1x8x32xf32>
    %128 = vector.shape_cast %127 : vector<1x8x32xf32> to vector<8x32xf32>
    %129 = vector.shape_cast %126 : vector<8x32xf32> to vector<1x8x32xf32>
    tpu.vector_store %arg14[%c0_60, %c0_61, %c0_62], %129 {strides = array<i32>} : memref<1x8x32xf32, #tpu.memory_space<vmem>>, vector<1x8x32xf32>,
    return
  }
  func.func @transform_0(%arg0: i32, %arg1: i32) -> (i32, i32, i32) {
    %c0_i32 = arith.constant 0 : i32
    %c0_i32_0 = arith.constant 0 : i32
    return %arg0, %arg1, %c0_i32 : i32, i32, i32
  }
  func.func @transform_1(%arg0: i32, %arg1: i32) -> (i32, i32, i32) {
    %c0_i32 = arith.constant 0 : i32
    %c0_i32_0 = arith.constant 0 : i32
    return %arg0, %arg1, %c0_i32 : i32, i32, i32
  }
  func.func @transform_2(%arg0: i32, %arg1: i32) -> (i32, i32, i32) {
    %c0_i32 = arith.constant 0 : i32
    %c0_i32_0 = arith.constant 0 : i32
    %c0_i32_1 = arith.constant 0 : i32
    return %arg0, %c0_i32, %c0_i32_0 : i32, i32, i32
  }
  func.func @transform_3(%arg0: i32, %arg1: i32) -> (i32, i32, i32) {
    %c0_i32 = arith.constant 0 : i32
    %c0_i32_0 = arith.constant 0 : i32
    %c0_i32_1 = arith.constant 0 : i32
    return %arg0, %c0_i32, %c0_i32_0 : i32, i32, i32
  }
  func.func @transform_4(%arg0: i32, %arg1: i32) -> (i32, i32) {
    %c0_i32 = arith.constant 0 : i32
    %c0_i32_0 = arith.constant 0 : i32
    %c0_i32_1 = arith.constant 0 : i32
    return %c0_i32, %c0_i32_0 : i32, i32
  }
  func.func @transform_5(%arg0: i32, %arg1: i32) -> (i32, i32) {
    %c0_i32 = arith.constant 0 : i32
    %c0_i32_0 = arith.constant 0 : i32
    %c0_i32_1 = arith.constant 0 : i32
    return %c0_i32, %c0_i32_0 : i32, i32
  }
  func.func @transform_6(%arg0: i32, %arg1: i32) -> (i32, i32) {
    %c0_i32 = arith.constant 0 : i32
    %c0_i32_0 = arith.constant 0 : i32
    %c0_i32_1 = arith.constant 0 : i32
    return %c0_i32, %c0_i32_0 : i32, i32
  }
  func.func @transform_7(%arg0: i32, %arg1: i32) -> (i32, i32) {
    %c0_i32 = arith.constant 0 : i32
    %c0_i32_0 = arith.constant 0 : i32
    %c0_i32_1 = arith.constant 0 : i32
    return %c0_i32, %c0_i32_0 : i32, i32
  }
  func.func @transform_8(%arg0: i32, %arg1: i32) -> (i32, i32) {
    %c0_i32 = arith.constant 0 : i32
    %c0_i32_0 = arith.constant 0 : i32
    %c0_i32_1 = arith.constant 0 : i32
    return %c0_i32, %c0_i32_0 : i32, i32
  }
  func.func @transform_9(%arg0: i32, %arg1: i32) -> (i32, i32) {
    %c0_i32 = arith.constant 0 : i32
    %c0_i32_0 = arith.constant 0 : i32
    %c0_i32_1 = arith.constant 0 : i32
    return %c0_i32, %c0_i32_0 : i32, i32
  }
  func.func @transform_10(%arg0: i32, %arg1: i32) -> (i32, i32) {
    %c0_i32 = arith.constant 0 : i32
    %c0_i32_0 = arith.constant 0 : i32
    %c0_i32_1 = arith.constant 0 : i32
    return %c0_i32, %c0_i32_0 : i32, i32
  }
  func.func @transform_11(%arg0: i32, %arg1: i32) -> (i32, i32) {
    %c0_i32 = arith.constant 0 : i32
    %c0_i32_0 = arith.constant 0 : i32
    %c0_i32_1 = arith.constant 0 : i32
    return %c0_i32, %c0_i32_0 : i32, i32
  }
  func.func @transform_12(%arg0: i32, %arg1: i32) -> (i32, i32, i32) {
    %c0_i32 = arith.constant 0 : i32
    %c0_i32_0 = arith.constant 0 : i32
    return %arg0, %arg1, %c0_i32 : i32, i32, i32
  }
}

</mosaic_0001>

<bundles_post_ra>
// kernel: vit_block.2
= control target key start
LH: loop header
LB: loop body
LE: loop exit
PB: predicated region body
PF: predicated region fallthrough
CT: control target
= control target key end

     0   :  { %s921_s17 = smov 0   ;;  %s923_s18 = smov 0   ;;  %s1002_s0 = inlined_call_operand.vmem [shape: f32[2,8,32], index: 0, kind: input, shape index: {}]   ;;  %s1003_s1 = inlined_call_operand.vmem [shape: f32[1,32], index: 1, kind: input, shape index: {}]   ;;  %s1004_s2 = inlined_call_operand.vmem [shape: f32[1,32], index: 2, kind: input, shape index: {}]   ;;  %s1005_s3 = inlined_call_operand.vmem [shape: bf16[32,32], index: 3, kind: input, shape index: {}]   ;;  %s1006_s4 = inlined_call_operand.vmem [shape: bf16[32,32], index: 4, kind: input, shape index: {}]   ;;  %s1007_s5 = inlined_call_operand.vmem [shape: bf16[32,32], index: 5, kind: input, shape index: {}]   ;;  %s1008_s6 = inlined_call_operand.vmem [shape: f32[1,32], index: 6, kind: input, shape index: {}]   ;;  %s1009_s7 = inlined_call_operand.vmem [shape: f32[1,32], index: 7, kind: input, shape index: {}]   ;;  %s1010_s8 = inlined_call_operand.vmem [shape: f32[1,32], index: 8, kind: input, shape index: {}]   ;;  %s1011_s9 = inlined_call_operand.vmem [shape: bf16[2,8,32], index: 9, kind: output, shape index: {0}]   ;;  %s1012_s10 = inlined_call_operand.vmem [shape: bf16[2,8,32], index: 10, kind: output, shape index: {1}]   ;;  %s1013_s11 = inlined_call_operand.vmem [shape: bf16[2,8,32], index: 11, kind: output, shape index: {2}]  }
   0x1   :  { %s925_s19 = smov 0  }
   0x2 LB: > { %s34_s20 = sadd.s32 1, %s854_s18  ;;  %p762_p0 = scmp.ge.s32.totalorder %s858_s19, 1  ;;  %s858_s19 = sphi %s925_s19, %s22_s19   ;;  %s854_s18 = sphi %s923_s18, %s1015_s18   ;;  %s850_s17 = sphi %s921_s17, %s1014_s17  }
   0x3   : > { %p36_p1 = scmp.ge.s32.totalorder %s34_s20, 2  ;;  %p364_p2 = scmp.lt.s32.totalorder %s858_s19, 3 }
   0x5   : > { %s1017_s20 = smov (%p36_p1, %s34_s20), 0  ;;  %p365_p3 = pnand %p762_p0, %p364_p2 }
   0x6   : > { %p422_p4 = scmp.lt.s32.totalorder (!%p365_p3), %s850_s17, 1 }
   0x7   : > { %368 = sbr.rel (%p365_p3) target bundleno = 427 (0x1ab), region = 56 }
   0xc   : > { %s1019_s17 = smov (!%p422_p4, %s850_s17), 1  ;;  %vm454_vm0 = vcmask 261120   ;;  %v860_v2 = vmov 32.0   ;;  %v797_v14 = vld [vmem:[%s1005_s3 + $0x8] sm:$0xff]  ;;  %v796_v17 = vld [vmem:[%s1005_s3] sm:$0xff]  ;;  %vm596_vm5 = vcmask 257024  }
   0xd   : > { %s763_s21 = sshll.u32 %s1019_s17, 3  ;;  %832 = vrcp.f32 %v860_v2  ;;  %v799_v15 = vld [vmem:[%s1006_s4 + $0x8] sm:$0xff]  ;;  %522 = vmatpush.bf16.msra.mxu0 %v797_v14  ;;  %v798_v18 = vld [vmem:[%s1006_s4] sm:$0xff]  ;;  %s764_s30 = sshll.u32 %s1019_s17, 2 }
   0xe   : > { %s428_s24 = scalar_lea.vmem %s1002_s0, %s763_s21  ;;  %v801_v16 = vld [vmem:[%s1007_s5 + $0x8] sm:$0xff]  ;;  %555 = vmatpush.bf16.msra.mxu1 %v799_v15  ;;  %v800_v19 = vld [vmem:[%s1007_s5] sm:$0xff]  ;;  %s435_s14 = scalar_lea.vmem %s1011_s9, %s764_s30 }
   0xf   : > { %v451_v0 = vld [vmem:[%s428_s24] sm:$0xff]  ;;  %588 = vmatpush.bf16.msra.mxu2 %v801_v16  ;;  %s442_s21 = scalar_lea.vmem %s1012_s10, %s764_s30  ;;  %s449_s25 = scalar_lea.vmem %s1013_s11, %s764_s30 }
  0x10   : > { %v455_v1 = vsel %vm454_vm0, %v451_v0, 0.0  ;;  %v827_v29 = vld [vmem:[%s1003_s1] ss:$0 sm:$0xff] }
  0x11   : > { %456 = vadd.xlane.f32.xlu0 %v455_v1  ;;  %523 = vmatpush.bf16.msra.mxu0 %v796_v17  ;;  %v828_v32 = vld [vmem:[%s1004_s2] ss:$0 sm:$0xff] }
  0x12   : > { %556 = vmatpush.bf16.msra.mxu1 %v798_v18  ;;  %v829_v36 = vld [vmem:[%s1008_s6] ss:$0 sm:$0xff] }
  0x13   : > { %v833_v3 = vpop.eup %832  ;;  %589 = vmatpush.bf16.msra.mxu2 %v800_v19  ;;  %v830_v37 = vld [vmem:[%s1009_s7] ss:$0 sm:$0xff] }
  0x14   : > { %v459_v4 = vmul.f32 32.0, %v833_v3  ;;  %vm463_vm1 = vweird.f32 %v833_v3  ;;  %v831_v44 = vld [vmem:[%s1010_s8] ss:$0 sm:$0xff] }
  0x16   : > { %v460_v5 = vsub.f32 1.0, %v459_v4 }
  0x18   : > { %v461_v6 = vmul.f32 %v833_v3, %v460_v5 }
  0x1a   : > { %v462_v7 = vadd.f32 %v833_v3, %v461_v6 }
  0x1c   : > { %v464_v8 = vsel %vm463_vm1, %v833_v3, %v462_v7 }
  0x84   : > { %v457_v9 = vpop.xlane.xlu0 %456 }
  0x85   : > { %v465_v10 = vmul.f32 %v464_v8, %v457_v9 }
  0x87   : > { %v466_v11 = vsub.f32 %v451_v0, %v465_v10 }
  0x89   : > { %v467_v12 = vmul.f32 %v466_v11, %v466_v11 }
  0x8b   : > { %v468_v13 = vsel %vm454_vm0, %v467_v12, 0.0 }
  0x8c   : > { %469 = vadd.xlane.f32.xlu0 %v468_v13 }
  0xff   : > { %v470_v20 = vpop.xlane.xlu0 %469 }
 0x100   : > { %v471_v21 = vmul.f32 %v470_v20, %v464_v8 }
 0x102   : > { %v472_v22 = vadd.f32 1e-05, %v471_v21 }
 0x104   : > { %834 = vrsqrt.f32 %v472_v22  ;;  %vm479_vm3 = vweird.f32 %v472_v22 }
 0x10a   : > { %v835_v23 = vpop.eup %834 }
 0x10b   : > { %v474_v24 = vmul.f32 %v835_v23, %v472_v22  ;;  %vm480_vm2 = vweird.f32 %v835_v23 }
 0x10c   : > { %vm481_vm4 = vmor %vm479_vm3, %vm480_vm2 }
 0x10d   : > { %v475_v25 = vmul.f32 %v835_v23, %v474_v24 }
 0x10f   : > { %v476_v26 = vmul.f32 0.5, %v475_v25 }
 0x111   : > { %v477_v27 = vsub.f32 1.5, %v476_v26 }
 0x113   : > { %v478_v28 = vmul.f32 %v835_v23, %v477_v27 }
 0x115   : > { %v482_v30 = vsel %vm481_vm4, %v835_v23, %v478_v28 }
 0x116   : > { %v483_v31 = vmul.f32 %v482_v30, %v466_v11 }
 0x118   : > { %v487_v33 = vmul.f32 %v827_v29, %v483_v31 }
 0x11a   : > { %v491_v34 = vadd.f32 %v828_v32, %v487_v33 }
 0x11c   : > { %v492_v35 = vpack.c.bf16 %v491_v34, %v491_v34 }
 0x11e   : > { %775 = vmatmul.msk.bf16.vlgmr.msra.gmra.mxu0 %vm454_vm0, %v492_v35  ;;  %784 = vmatmul.msk.bf16.vlgmr.msra.gmra.mxu1 %vm454_vm0, %v492_v35 }
 0x11f   : > { %793 = vmatmul.msk.bf16.vlgmr.msra.gmra.mxu2 %vm454_vm0, %v492_v35 }
 0x19b   : > { %v525_v38 = vpop.f32.mrf.mxu0  ;;  %v558_v39 = vpop.f32.mrf.mxu1 }
 0x19c   : > { %v526_v40 = vadd.f32 %v829_v36, %v525_v38  ;;  %v559_v41 = vadd.f32 %v830_v37, %v558_v39 }
 0x19e   : > { %v595_v42 = vpack.c.bf16 %v526_v40, %v526_v40  ;;  %v598_v43 = vpack.c.bf16 %v559_v41, %v559_v41 }
 0x1a0   : > { %597 = vst.msk [vmem:[%s435_s14] sm:$0xf] %vm596_vm5, %v595_v42 }
 0x1a1   : > { %599 = vst.msk [vmem:[%s442_s21] sm:$0xf] %vm596_vm5, %v598_v43 }
 0x1a2   : > { %v591_v45 = vpop.f32.mrf.mxu2 }
 0x1a3   : > { %v592_v46 = vadd.f32 %v831_v44, %v591_v45  ;;  %v527_v47 = vpop.f32.mrf.mxu0  ;;  %v560_v48 = vpop.f32.mrf.mxu1 }
 0x1a5   : > { %v600_v49 = vpack.c.bf16 %v592_v46, %v592_v46 }
 0x1a7   : > { %601 = vst.msk [vmem:[%s449_s25] sm:$0xf] %vm596_vm5, %v600_v49 }
 0x1aa   : > { %v593_v50 = vpop.f32.mrf.mxu2 }
 0x1ab PF: > { %s22_s19 = sadd.s32 1, %s858_s19   ;;  %s1014_s17 = smov %s854_s18 }
 0x1ac   : > { %p19_p5 = scmp.ge.s32.totalorder %s22_s19, 4   ;;  %s1015_s18 = smov %s1017_s20 }
 0x1ae   :  { %21 = sbr.rel (!%p19_p5) target bundleno = 2 (0x2), region = 110 }

// kernel: vit_block.3
= control target key start
LH: loop header
LB: loop body
LE: loop exit
PB: predicated region body
PF: predicated region fallthrough
CT: control target
= control target key end

     0   :  { %s1653_s0 = inlined_call_operand.vmem [shape: f32[2,8,32], index: 0, kind: input, shape index: {}]   ;;  %s1654_s1 = inlined_call_operand.vmem [shape: bf16[2,8,32], index: 1, kind: input, shape index: {}]   ;;  %s1655_s2 = inlined_call_operand.vmem [shape: bf16[2,8,32], index: 2, kind: input, shape index: {}]   ;;  %s1656_s3 = inlined_call_operand.vmem [shape: bf16[2,8,32], index: 3, kind: input, shape index: {}]   ;;  %s1657_s4 = inlined_call_operand.vmem [shape: bf16[32,32], index: 4, kind: input, shape index: {}]   ;;  %s1658_s5 = inlined_call_operand.vmem [shape: f32[1,32], index: 5, kind: input, shape index: {}]   ;;  %s1659_s6 = inlined_call_operand.vmem [shape: f32[1,32], index: 6, kind: input, shape index: {}]   ;;  %s1660_s7 = inlined_call_operand.vmem [shape: f32[1,32], index: 7, kind: input, shape index: {}]   ;;  %s1661_s8 = inlined_call_operand.vmem [shape: bf16[32,128], index: 8, kind: input, shape index: {}]   ;;  %s1662_s9 = inlined_call_operand.vmem [shape: f32[1,128], index: 9, kind: input, shape index: {}]   ;;  %s1663_s10 = inlined_call_operand.vmem [shape: bf16[128,32], index: 10, kind: input, shape index: {}]   ;;  %s1664_s11 = inlined_call_operand.vmem [shape: f32[1,32], index: 11, kind: input, shape index: {}]   ;;  %s1665_s12 = inlined_call_operand.hbm [shape: f32[2,8,32], index: 12, kind: output, shape index: {}]  }
   0x1   :  { %1668 = sst [smem:[#allocation8_spill]] %s1653_s0 }
   0x2   :  { %1669 = sst [smem:[#allocation9_spill]] %s1654_s1 }
   0x3   :  { %17 = vsyncpa [#allocation4], 0 }
   0x4   :  { %19 = vsyncpa [#allocation4 + $0x1], 0  ;;  %s1446_s21 = smov 0   ;;  %s1448_s22 = smov 0  }
   0x5   :  { %s1450_s23 = smov 0   ;;  %s1452_s24 = smov 0  }
   0x6   :  { %s1454_s25 = smov 0   ;;  %s1456_s26 = smov 0  }
   0x7 LB: > { %1670 = sst [smem:[#allocation6_spill]] %s1368_s25  ;;  %s1120_s27 = sadd.s32 4294967295, %s1372_s26   ;;  %s1372_s26 = sphi %s1456_s26, %s25_s26   ;;  %s1368_s25 = sphi %s1454_s25, %s1677_s25   ;;  %s1364_s24 = sphi %s1452_s24, %s1676_s24   ;;  %s1360_s23 = sphi %s1450_s23, %s1680_s23   ;;  %s1356_s22 = sphi %s1448_s22, %s1679_s22   ;;  %s1352_s21 = sphi %s1446_s21, %s1678_s21  }
   0x8   : > { %s1121_s28 = sadd.s32 4294967294, %s1372_s26   ;;  %s37_s29 = sadd.s32 1, %s1368_s25 }
   0x9   : > { %s322_s30 = sadd.s32 1, %s1360_s23  ;;  %p39_p0 = scmp.ge.s32.totalorder %s37_s29, 2 }
   0xa   : > { %p332_p1 = scmp.ne.s32.totalorder %s1360_s23, %s1356_s22  ;;  %p333_p2 = scmp.eq.s32.totalorder %s1120_s27, 1 }
   0xb   : > { %p338_p3 = scmp.ne.s32.totalorder %s1356_s22, %s1352_s21  ;;  %s1682_s29 = smov (%p39_p0, %s37_s29), 0 }
   0xc   : > { %1671 = sst [smem:[#allocation7_spill]] %s1682_s29  ;;  %p1486_p4 = por %p333_p2, %p332_p1 }
   0xd   : > { %p339_p5 = scmp.eq.s32.totalorder %s1121_s28, 1  ;;  %s317_s14 = ssub.s32 %s1368_s25, %s1682_s29 }
   0xe   : > { %p1124_p6 = scmp.ge.s32.totalorder %s1372_s26, 1  ;;  %p320_p7 = scmp.eq.s32.totalorder %s317_s14, 0 }
   0xf   : > { %p1493_p8 = por %p339_p5, %p338_p3  ;;  %p415_p9 = scmp.lt.s32.totalorder %s1372_s26, 3 }
  0x10   : > { %s1499_s16 = scalar_select %p320_p7, %s1360_s23, %s322_s30  }
  0x11   : > { %p416_p10 = pnand %p1124_p6, %p415_p9 }
  0x12   : > { %p474_p11 = scmp.lt.s32.totalorder (!%p416_p10), %s1364_s24, 1  ;;  %s1674_s1 = sld [smem:[#allocation9_spill]] (!%p416_p10) }
  0x13   : > { %419 = sbr.rel (%p416_p10) target bundleno = 1572 (0x624), region = 68  ;;  %s1374_s29 = smov (!%p416_p10), 120  }
  0x14   : > { %s1375_s25 = smov (!%p416_p10), 104   ;;  %s1376_s19 = smov (!%p416_p10), 112  }
  0x15   : > { %s1675_s0 = sld [smem:[#allocation8_spill]] (!%p416_p10) }
  0x18   : > { %s1503_s17 = scalar_select %p474_p11, %s1364_s24, 1  ;;  %vm501_vm0 = vcmask 64512   ;;  %vm534_vm1 = vcmask 1043456   ;;  %vm623_vm2 = vcmask 130112   ;;  %vm685_vm3 = vcmask 195712  }
  0x19   : > { %vm747_vm4 = vcmask 261312   ;;  %vm771_vm5 = vcmask 261120  }
  0x1a   : > { %s1506_s18 = sshll.u32 %s1503_s17, 2 }
  0x1b   : > { %s491_s27 = scalar_lea.vmem %s1655_s2, %s1506_s18  ;;  %s487_s14 = scalar_lea.vmem %s1674_s1, %s1506_s18 }
  0x1c   : > { %v499_v0 = vld [vmem:[%s491_s27] sm:$0xf]  ;;  %s495_s28 = scalar_lea.vmem %s1656_s3, %s1506_s18  ;;  %s1379_s18 = smov 16  }
  0x1d   : > { %v498_v1 = vld [vmem:[%s487_s14] sm:$0xf]  ;;  %v506_v2 = vsel %vm501_vm0, %v499_v0, 0  ;;  %v560_v3 = vunpack.c.l.b16 %v499_v0  ;;  %s1126_s27 = sshll.u32 %s1503_s17, 3 }
  0x1e   : > { %v555_v4 = vunpack.c.l.b16 %v498_v1  ;;  %515 = vmatpush.bf16.xpose.msra.mxu2 %v506_v2  ;;  %v500_v15 = vld [vmem:[%s495_s28] sm:$0xf] }
  0x1f   : > { %v561_v5 = vpack.c.b16 %v560_v3, %v560_v3  ;;  %v536_v16 = vsel %vm534_vm1, %v500_v15, 0  ;;  %v594_v17 = vunpack.c.l.b16 %v500_v15 }
  0x20   : > { %v556_v6 = vpack.c.b16 %v555_v4, %v555_v4  ;;  %545 = vmatpush.bf16.msra.mxu1 %v536_v16 }
  0x21   : > { %689 = vrot.lane.b32.xlu2 %v561_v5, %s1375_s25  ;;  %v595_v18 = vpack.c.b16 %v594_v17, %v594_v17 }
  0x22   : > { %557 = vrot.lane.b32.xlu1 %v556_v6, %s1374_s29 }
  0x25   : > { %1130 = vmatmul.msk.bf16.vlgmr.msra.gmra.mxu2 %vm501_vm0, %v498_v1 }
  0x29   : > { %625 = vrot.lane.b32.xlu2 %v556_v6, %s1376_s19 }
  0x2a   : > { %627 = vrot.lane.b32.xlu1 %v561_v5, %s1376_s19 }
  0x32   : > { %687 = vrot.lane.b32.xlu1 %v556_v6, %s1375_s25 }
  0x3a   : > { %596 = vrot.lane.b32.xlu1 %v595_v18, %s1374_s29 }
  0x7b   : > { %v690_v8 = vpop.permute.xlu2 %689 }
  0x7c   : > { %v695_v9 = vsel %vm501_vm0, %v690_v8, 0 }
  0x7d   : > { %704 = vmatpush.bf16.xpose.msra.mxu0 %v695_v9 }
  0x83   : > { %v626_v30 = vpop.permute.xlu2 %625 }
  0x94   : > { %v558_v7 = vpop.permute.xlu1 %557 }
  0x9c   : > { %v628_v10 = vpop.permute.xlu1 %627 }
  0x9d   : > { %v633_v19 = vsel %vm501_vm0, %v628_v10, 0 }
  0x9e   : > { %642 = vmatpush.bf16.xpose.msrb.mxu1 %v633_v19  ;;  %v1193_v19 = vld [vmem:[%s1657_s4] sm:$0xff] }
  0xa4   : > { %v688_v13 = vpop.permute.xlu1 %687 }
  0xa5   : > { %1136 = vmatmul.msk.bf16.vlgmr.msra.gmra.mxu0 %vm501_vm0, %v688_v13 }
  0xa8   : > { %v517_v11 = vpop.f32.mrf.mxu2 }
  0xa9   : > { %v521_v12 = vsel %vm501_vm0, %v517_v11, -inf }
  0xaa   : > { %522 = vmax.xlane.f32.xlu0 %v521_v12 }
  0xac   : > { %v597_v40 = vpop.permute.xlu1 %596 }
  0xad   : > { %v602_v41 = vsel %vm534_vm1, %v597_v40, 0 }
  0xae   : > { %611 = vmatpush.bf16.msra.mxu3 %v602_v41 }
  0xb0   : > { %v519_v14 = vpop.f32.mrf.mxu2 }
  0xbe   : > { %562 = vrot.lane.b32.xlu0 %v561_v5, %s1374_s29  ;;  %s1378_s29 = smov 24  }
 0x11d   : > { %v523_v20 = vpop.xlane.xlu0 %522 }
 0x11e   : > { %v524_v21 = vsub.f32 %v517_v11, %v523_v20 }
 0x120   : > { %v525_v22 = vmul.f32 1.442695, %v524_v21 }
 0x122   : > { %1272 = vpow2.f32 %v525_v22  ;;  %v706_v25 = vpop.f32.mrf.mxu0 }
 0x123   : > { %v710_v26 = vsel %vm501_vm0, %v706_v25, -inf }
 0x124   : > { %711 = vmax.xlane.f32.xlu1 %v710_v26 }
 0x128   : > { %v1273_v23 = vpop.eup %1272 }
 0x129   : > { %v530_v24 = vpack.c.bf16 %v1273_v23, %v1273_v23  ;;  %v527_v39 = vsel %vm501_vm0, %v1273_v23, 0.0 }
 0x12a   : > { %v708_v29 = vpop.f32.mrf.mxu0 }
 0x12b   : > { %1131 = vmatmul.msk.bf16.vlgmr.msra.gmra.mxu1 %vm501_vm0, %v530_v24 }
 0x130   : > { %v563_v27 = vpop.permute.xlu0 %562 }
 0x131   : > { %v568_v28 = vsel %vm501_vm0, %v563_v27, 0 }
 0x132   : > { %577 = vmatpush.bf16.xpose.msrb.mxu2 %v568_v28 }
 0x139   : > { %1132 = vmatmul.msk.bf16.vlgmr.msrb.gmra.mxu2 %vm501_vm0, %v558_v7 }
 0x13b   : > { %1134 = vmatmul.msk.bf16.vlgmr.msrb.gmra.mxu1 %vm501_vm0, %v626_v30 }
 0x197   : > { %v712_v44 = vpop.xlane.xlu1 %711 }
 0x198   : > { %v713_v47 = vsub.f32 %v706_v25, %v712_v44  ;;  %v1267_v25 = vld [vmem:[%s1658_s5] ss:$0 sm:$0xff]  ;;  %v1196_v44 = vld [vmem:[%s1661_s8 + $0x8] sm:$0xff] }
 0x19a   : > { %v714_v50 = vmul.f32 1.442695, %v713_v47 }
 0x1a8   : > { %v547_v31 = vpop.f32.mrf.mxu1 }
 0x1b0   : > { %v549_v32 = vpop.f32.mrf.mxu1 }
 0x1b1   : > { %v1380_v32 = vmov 32.0  }
 0x1b8   : > { %v644_v33 = vpop.f32.mrf.mxu1 }
 0x1b9   : > { %v648_v34 = vsel %vm501_vm0, %v644_v33, -inf }
 0x1ba   : > { %649 = vmax.xlane.f32.xlu0 %v648_v34 }
 0x1bc   : > { %v579_v35 = vpop.f32.mrf.mxu2 }
 0x1bd   : > { %v583_v36 = vsel %vm501_vm0, %v579_v35, -inf }
 0x1be   : > { %584 = vmax.xlane.f32.xlu2 %v583_v36 }
 0x1c0   : > { %v646_v37 = vpop.f32.mrf.mxu1 }
 0x1c4   : > { %v581_v38 = vpop.f32.mrf.mxu2 }
 0x1ce   : > { %720 = vrot.lane.b32.xlu0 %v595_v18, %s1375_s25  ;;  %s1377_s25 = smov 8  }
 0x1d6   : > { %658 = vrot.lane.b32.xlu2 %v595_v18, %s1376_s19  ;;  %v1194_v18 = vld [vmem:[%s1657_s4 + $0x8] sm:$0xff] }
 0x1d7   : > { %781 = vmatpush.bf16.msra.mxu1 %v1194_v18 }
 0x1db   : > { %782 = vmatpush.bf16.msra.mxu1 %v1193_v19 }
 0x1f8   : > { %528 = vadd.xlane.f32.xlu0 %v527_v39 }
 0x22d   : > { %v650_v42 = vpop.xlane.xlu0 %649 }
 0x22e   : > { %v651_v43 = vsub.f32 %v644_v33, %v650_v42 }
 0x230   : > { %v652_v45 = vmul.f32 1.442695, %v651_v43 }
 0x231   : > { %v585_v46 = vpop.xlane.xlu2 %584 }
 0x232   : > { %1274 = vpow2.f32 %v652_v45  ;;  %v586_v48 = vsub.f32 %v579_v35, %v585_v46  ;;  %v1195_v45 = vld [vmem:[%s1661_s8] sm:$0xff] }
 0x234   : > { %v587_v49 = vmul.f32 1.442695, %v586_v48 }
 0x236   : > { %1276 = vpow2.f32 %v587_v49 }
 0x237   : > { %1278 = vpow2.f32 %v714_v50 }
 0x238   : > { %v1275_v51 = vpop.eup %1274 }
 0x239   : > { %v654_v52 = vsel %vm501_vm0, %v1275_v51, 0.0  ;;  %v659_v53 = vpop.permute.xlu2 %658  ;;  %v657_v63 = vpack.c.bf16 %v1275_v51, %v1275_v51 }
 0x23a   : > { %655 = vadd.xlane.f32.xlu2 %v654_v52  ;;  %v664_v54 = vsel %vm534_vm1, %v659_v53, 0 }
 0x23b   : > { %673 = vmatpush.bf16.msrb.mxu3 %v664_v54 }
 0x23c   : > { %v1277_v55 = vpop.eup %1276 }
 0x23d   : > { %v589_v56 = vsel %vm501_vm0, %v1277_v55, 0.0  ;;  %v592_v57 = vpack.c.bf16 %v1277_v55, %v1277_v55  ;;  %v1279_v58 = vpop.eup %1278  ;;  %v1268_v55 = vld [vmem:[%s1659_s6] ss:$0 sm:$0xff] }
 0x23e   : > { %590 = vadd.xlane.f32.xlu1 %v589_v56  ;;  %v719_v61 = vpack.c.bf16 %v1279_v58, %v1279_v58  ;;  %v716_v62 = vsel %vm501_vm0, %v1279_v58, 0.0  ;;  %v1269_v58 = vld [vmem:[%s1660_s7] ss:$0 sm:$0xff] }
 0x23f   : > { %1133 = vmatmul.msk.bf16.vlgmr.msra.gmra.mxu3 %vm501_vm0, %v592_v57 }
 0x240   : > { %v721_v59 = vpop.permute.xlu0 %720  ;;  %858 = vmatpush.bf16.msra.mxu3 %v1196_v44 }
 0x241   : > { %v726_v60 = vsel %vm534_vm1, %v721_v59, 0 }
 0x242   : > { %735 = vmatpush.bf16.msra.mxu2 %v726_v60 }
 0x244   : > { %859 = vmatpush.bf16.msra.mxu3 %v1195_v45 }
 0x245   : > { %1137 = vmatmul.msk.bf16.vlgmr.msra.gmra.mxu2 %vm501_vm0, %v719_v61 }
 0x246   : > { %717 = vadd.xlane.f32.xlu1 %v716_v62  ;;  %v1204_v62 = vld [vmem:[%s1663_s10 + $0x38] sm:$0xff] }
 0x247   : > { %978 = vmatpush.bf16.msrb.mxu0 %v1204_v62 }
 0x24f   : > { %1135 = vmatmul.msk.bf16.vlgmr.msrb.gmra.mxu3 %vm501_vm0, %v657_v63  ;;  %v1203_v63 = vld [vmem:[%s1663_s10 + $0x30] sm:$0xff] }
 0x250   : > { %979 = vmatpush.bf16.msrb.mxu0 %v1203_v63 }
 0x26b   : > { %v529_v0 = vpop.xlane.xlu0 %528 }
 0x26c   : > { %1280 = vrcp.f32 %v529_v0  ;;  %v1270_v0 = vld [vmem:[%s1662_s9] ss:$0 sm:$0xff] }
 0x272   : > { %v1281_v1 = vpop.eup %1280 }
 0x273   : > { %v552_v2 = vmul.f32 %v1281_v1, %v547_v31 }
 0x275   : > { %553 = vst.msk [vmem:[#allocation2] sm:$0xff] %vm501_vm0, %v552_v2  ;;  %v1202_v2 = vld [vmem:[%s1663_s10 + $0x28] sm:$0xff] }
 0x276   : > { %980 = vmatpush.bf16.msrb.mxu0 %v1202_v2 }
 0x2ad   : > { %v656_v10 = vpop.xlane.xlu2 %655 }
 0x2b1   : > { %v591_v3 = vpop.xlane.xlu1 %590 }
 0x2b2   : > { %1282 = vrcp.f32 %v591_v3 }
 0x2b8   : > { %v1283_v5 = vpop.eup %1282 }
 0x2b9   : > { %v718_v4 = vpop.xlane.xlu1 %717 }
 0x2ba   : > { %1284 = vrcp.f32 %v718_v4 }
 0x2bb   : > { %1286 = vrcp.f32 %v656_v10 }
 0x2bc   : > { %1288 = vrcp.f32 %v1380_v32 }
 0x2c0   : > { %v1285_v8 = vpop.eup %1284 }
 0x2c1   : > { %v1287_v14 = vpop.eup %1286 }
 0x2c2   : > { %v613_v6 = vpop.f32.mrf.mxu3  ;;  %v1289_v33 = vpop.eup %1288 }
 0x2c3   : > { %v618_v7 = vmul.f32 %v1283_v5, %v613_v6  ;;  %v795_v34 = vmul.f32 32.0, %v1289_v33  ;;  %vm799_vm6 = vweird.f32 %v1289_v33  ;;  %v1201_v5 = vld [vmem:[%s1663_s10 + $0x20] sm:$0xff] }
 0x2c4   : > { %981 = vmatpush.bf16.msrb.mxu0 %v1201_v5 }
 0x2c5   : > { %620 = vrot.lane.b32.xlu1 %v618_v7, %s1377_s25  ;;  %v796_v35 = vsub.f32 1.0, %v795_v34  ;;  %s471_s25 = sand.u32 1, %s1356_s22  }
 0x2c7   : > { %v797_v36 = vmul.f32 %v1289_v33, %v796_v35 }
 0x2c8   : > { %v737_v9 = vpop.f32.mrf.mxu2 }
 0x2c9   : > { %v742_v11 = vmul.f32 %v1285_v8, %v737_v9  ;;  %v798_v37 = vadd.f32 %v1289_v33, %v797_v36  ;;  %v1200_v9 = vld [vmem:[%s1663_s10 + $0x18] sm:$0xff] }
 0x2ca   : > { %v615_v12 = vpop.f32.mrf.mxu3  ;;  %982 = vmatpush.bf16.msrb.mxu0 %v1200_v9 }
 0x2cb   : > { %744 = vrot.lane.b32.xlu2 %v742_v11, %s1378_s29  ;;  %s480_s29 = scalar_lea.vmem %s1675_s0, %s1126_s27  ;;  %v800_v38 = vsel %vm799_vm6, %v1289_v33, %v798_v37 }
 0x2cc   : > { %v497_v26 = vld [vmem:[%s480_s29] sm:$0xff]  ;;  %s1125_s29 = sshll.u32 %s471_s25, 3 }
 0x2cd   : > { %s473_s27 = scalar_lea.vmem [#allocation3], %s1125_s29  ;;  %s1314_s29 = scalar_lea.hbm %s1665_s12, 16 }
 0x2ce   : > { %s1007_s28 = sshll.u32 %s473_s27, 4  ;;  %s1008_s28 = int_to_ptr.vmem [resolvable:$true] %s1007_s28 }
 0x2d0   : > { %v739_v13 = vpop.f32.mrf.mxu2 }
 0x2d2   : > { %v675_v15 = vpop.f32.mrf.mxu3 }
 0x2d3   : > { %v680_v16 = vmul.f32 %v1287_v14, %v675_v15  ;;  %v1199_v14 = vld [vmem:[%s1663_s10 + $0x10] sm:$0xff] }
 0x2d4   : > { %983 = vmatpush.bf16.msrb.mxu0 %v1199_v14 }
 0x2d5   : > { %682 = vrot.lane.b32.xlu1 %v680_v16, %s1379_s18  ;;  %s1190_s18 = sshll.u32 %s1364_s24, 3  ;;  %s994_s24 = scalar_lea.sflag [#allocation4], %s471_s25 }
 0x2d6   : > { %s1005_s20 = scalar_lea.hbm %s1665_s12, %s1190_s18 }
 0x2d7   : > { %s1009_s0 = sshll.u32 %s1005_s20, 4  ;;  %s1010_s0 = int_to_ptr.hbm [resolvable:$true] %s1009_s0 }
 0x2d8   : > { %s1308_s1 = sshra.s32 %s1010_s0, 4  ;;  %s1309_s1 = int_to_ptr.hbm [resolvable:$true] %s1308_s1 }
 0x2d9   : > { %s1310_s30 = scalar_lea.hbm %s1309_s1, 8  ;;  %p1315_p1 = scmp.lt.s32.totalorder %s1309_s1, %s1665_s12 }
 0x2da   : > { %v677_v17 = vpop.f32.mrf.mxu3  ;;  %p1311_p12 = scmp.ne.s32.totalorder %s1309_s1, %s1310_s30  ;;  %p1316_p2 = scmp.lt.s32.totalorder %s1314_s29, %s1310_s30 }
 0x2db   : > { %v1198_v17 = vld [vmem:[%s1663_s10 + $0x8] sm:$0xff] }
 0x2dc   : > { %984 = vmatpush.bf16.msrb.mxu0 %v1198_v17  ;;  %p1312_p13 = pnand %p1311_p12, %p1486_p4  ;;  %p1317_p3 = por %p1316_p2, %p1315_p1 }
 0x2de   : > { %p1313_p0 = pneg %p1312_p13 }
 0x2e0   : > { %p1318_p5 = pnand %p1317_p3, %p1313_p0 }
 0x325   : > { %v745_v22 = vpop.permute.xlu2 %744 }
 0x337   : > { %v621_v20 = vpop.permute.xlu1 %620 }
 0x338   : > { %624 = vst.msk [vmem:[#allocation2] sm:$0xff] %vm623_vm2, %v621_v20 }
 0x347   : > { %v683_v21 = vpop.permute.xlu1 %682 }
 0x348   : > { %686 = vst.msk [vmem:[#allocation2] sm:$0xff] %vm685_vm3, %v683_v21  ;;  %v1197_v21 = vld [vmem:[%s1663_s10] sm:$0xff] }
 0x349   : > { %748 = vst.msk [vmem:[#allocation2] sm:$0xff] %vm747_vm4, %v745_v22  ;;  %985 = vmatpush.bf16.msrb.mxu0 %v1197_v21 }
 0x350   : > { %v749_v23 = vld [vmem:[#allocation2] sm:$0xff] }
 0x351   : > { %v750_v24 = vpack.c.bf16 %v749_v23, %v749_v23 }
 0x353   : > { %1146 = vmatmul.msk.bf16.vlgmr.msra.gmra.mxu1 %vm771_vm5, %v750_v24 }
 0x3d0   : > { %v784_v27 = vpop.f32.mrf.mxu1 }
 0x3d1   : > { %v785_v28 = vadd.f32 %v1267_v25, %v784_v27 }
 0x3d3   : > { %v1565_v29 = vadd.f32 %v785_v28, %v497_v26 }
 0x3d5   : > { %v791_v30 = vsel %vm771_vm5, %v1565_v29, 0.0 }
 0x3d6   : > { %792 = vadd.xlane.f32.xlu1 %v791_v30 }
 0x3d8   : > { %v786_v31 = vpop.f32.mrf.mxu1 }
 0x449   : > { %v793_v39 = vpop.xlane.xlu1 %792 }
 0x44a   : > { %v801_v40 = vmul.f32 %v800_v38, %v793_v39 }
 0x44c   : > { %v802_v41 = vsub.f32 %v1565_v29, %v801_v40 }
 0x44e   : > { %v803_v42 = vmul.f32 %v802_v41, %v802_v41 }
 0x450   : > { %v804_v43 = vsel %vm771_vm5, %v803_v42, 0.0 }
 0x451   : > { %805 = vadd.xlane.f32.xlu0 %v804_v43 }
 0x4c4   : > { %v806_v46 = vpop.xlane.xlu0 %805 }
 0x4c5   : > { %v807_v47 = vmul.f32 %v806_v46, %v800_v38 }
 0x4c7   : > { %v808_v48 = vadd.f32 1e-05, %v807_v47 }
 0x4c9   : > { %1290 = vrsqrt.f32 %v808_v48  ;;  %vm815_vm8 = vweird.f32 %v808_v48 }
 0x4cf   : > { %v1291_v49 = vpop.eup %1290 }
 0x4d0   : > { %v810_v50 = vmul.f32 %v1291_v49, %v808_v48  ;;  %vm816_vm7 = vweird.f32 %v1291_v49 }
 0x4d1   : > { %vm817_vm9 = vmor %vm815_vm8, %vm816_vm7 }
 0x4d2   : > { %v811_v51 = vmul.f32 %v1291_v49, %v810_v50 }
 0x4d4   : > { %v812_v52 = vmul.f32 0.5, %v811_v51  ;;  %v1271_v51 = vld [vmem:[%s1664_s11] ss:$0 sm:$0xff] }
 0x4d6   : > { %v813_v53 = vsub.f32 1.5, %v812_v52 }
 0x4d8   : > { %v814_v54 = vmul.f32 %v1291_v49, %v813_v53 }
 0x4da   : > { %v818_v56 = vsel %vm817_vm9, %v1291_v49, %v814_v54 }
 0x4db   : > { %v819_v57 = vmul.f32 %v818_v56, %v802_v41 }
 0x4dd   : > { %v823_v59 = vmul.f32 %v1268_v55, %v819_v57 }
 0x4df   : > { %v827_v60 = vadd.f32 %v1269_v58, %v823_v59 }
 0x4e1   : > { %v828_v61 = vpack.c.bf16 %v827_v60, %v827_v60 }
 0x4e3   : > { %1155 = vmatmul.msk.bf16.vlgmr.msra.gmra.mxu3 %vm771_vm5, %v828_v61 }
 0x566   : > { %v861_v1 = vpop.f32.mrf.mxu3 }
 0x567   : > { %v862_v3 = vadd.f32 %v1270_v0, %v861_v1 }
 0x569   : > { %v866_v4 = vmul.f32 0.70710677, %v862_v3  ;;  %v865_v47 = vmul.f32 0.5, %v862_v3 }
 0x56b   : > { %v867_v6 = vmul.f32 %v866_v4, %v866_v4 }
 0x56d   : > { %v868_v7 = vmin.f32 %v867_v6, 16.0 }
 0x56e   : > { %v863_v8 = vpop.f32.mrf.mxu3 }
 0x56f   : > { %v869_v10 = vmul.f32 2.1237322e-06, %v868_v7  ;;  %v880_v11 = vmul.f32 3.8918573e-05, %v868_v7 }
 0x571   : > { %v870_v12 = vadd.f32 0.00028619796, %v869_v10  ;;  %v881_v13 = vadd.f32 0.001143296, %v880_v11 }
 0x573   : > { %v871_v15 = vmul.f32 %v870_v12, %v868_v7  ;;  %v882_v16 = vmul.f32 %v881_v13, %v868_v7 }
 0x575   : > { %v883_v18 = vadd.f32 0.014752088, %v882_v16  ;;  %v872_v19 = vadd.f32 0.0036580483, %v871_v15 }
 0x577   : > { %v884_v20 = vmul.f32 %v883_v18, %v868_v7  ;;  %v873_v23 = vmul.f32 %v872_v19, %v868_v7 }
 0x579   : > { %v885_v22 = vadd.f32 0.112945676, %v884_v20  ;;  %v874_v26 = vadd.f32 0.05243302, %v873_v23 }
 0x57b   : > { %v886_v24 = vmul.f32 %v885_v22, %v868_v7  ;;  %v875_v30 = vmul.f32 %v874_v26, %v868_v7 }
 0x57d   : > { %v887_v25 = vadd.f32 0.4994258, %v886_v24  ;;  %v876_v31 = vadd.f32 0.18741608, %v875_v30 }
 0x57f   : > { %v888_v27 = vmul.f32 %v887_v25, %v868_v7  ;;  %v877_v33 = vmul.f32 %v876_v31, %v868_v7 }
 0x581   : > { %v889_v28 = vadd.f32 1.0, %v888_v27  ;;  %v878_v37 = vadd.f32 1.1283791, %v877_v33 }
 0x583   : > { %1292 = vrcp.f32 %v889_v28  ;;  %v901_v36 = vand.u32 2147483648, %v889_v28  ;;  %v899_v39 = vand.u32 2147483647, %v889_v28  ;;  %vm895_vm11 = vweird.f32 %v889_v28 }
 0x584   : > { %v879_v42 = vmul.f32 %v878_v37, %v866_v4 }
 0x585   : > { %v902_v41 = vor.u32 1.1754944e-38, %v901_v36  ;;  %vm900_vm13 = vcmp.eq.f32.partialorder %v899_v39, 8.507059e+37 }
 0x589   : > { %v1293_v32 = vpop.eup %1292 }
 0x58a   : > { %v891_v34 = vmul.f32 %v1293_v32, %v889_v28  ;;  %vm896_vm10 = vweird.f32 %v1293_v32 }
 0x58b   : > { %vm897_vm12 = vmor %vm895_vm11, %vm896_vm10 }
 0x58c   : > { %v892_v35 = vsub.f32 1.0, %v891_v34 }
 0x58e   : > { %v893_v38 = vmul.f32 %v1293_v32, %v892_v35 }
 0x590   : > { %v894_v40 = vadd.f32 %v1293_v32, %v893_v38 }
 0x592   : > { %v898_v43 = vsel %vm897_vm12, %v1293_v32, %v894_v40 }
 0x593   : > { %v903_v44 = vsel %vm900_vm13, %v902_v41, %v898_v43 }
 0x594   : > { %v904_v45 = vmul.f32 %v903_v44, %v879_v42 }
 0x596   : > { %v1156_v46 = vclamps-f32 %v904_v45, 1.0 }
 0x598   : > { %v907_v48 = vadd.f32 1.0, %v1156_v46 }
 0x59a   : > { %v908_v49 = vmul.f32 %v907_v48, %v865_v47 }
 0x59c   : > { %v909_v50 = vpack.c.bf16 %v908_v49, %v908_v49 }
 0x59e   : > { %986 = vmatmul.bf16.vlgmr.msrb.gmra.mxu0 %v909_v50 }
 0x61b   : > { %v987_v52 = vpop.f32.mrf.mxu0 }
 0x61c   : > { %v988_v53 = vadd.f32 %v1271_v51, %v987_v52 }
 0x61e   : > { %v991_v54 = vadd.f32 %v988_v53, %v1565_v29 }
 0x620   : > { %992 = vst.msk [vmem:[%s473_s27] sm:$0xff] %vm771_vm5, %v991_v54 }
 0x621   : > { %1321 = shalt.err (!%p1318_p5)
}
 0x622   : > { %1205 = dma.vmem_to_hbm [thread:$0]  (%p1486_p4), %s1008_s28, 128, %s1010_s0, %s994_s24  }
 0x623   : > { %v989_v29 = vpop.f32.mrf.mxu0 }
 0x624 PF: > { %p1211_p6 = scmp.ge.s32.totalorder %s1372_s26, 2  ;;  %s1021_s25 = sand.u32 1, %s1352_s21  }
 0x625   : > { %s1022_s20 = scalar_lea.sflag [#allocation4], %s1021_s25 }
 0x626   : > { %p1208_p7 = pnand %p1211_p6, %p1493_p8 }
 0x628   : > { %p1209_p9 = pneg %p1208_p7 }
 0x62a   : > { %1347 = dma.done.wait (%p1209_p9), %s1022_s20, 128  }
 0x62b   : > { %1349 = vsyncadd (%p1209_p9), %s1022_s20, 4294967168  ;;  %s25_s26 = sadd.s32 1, %s1372_s26   ;;  %s1676_s24 = sld [smem:[#allocation6_spill]] }
 0x62c   : > { %p22_p10 = scmp.ge.s32.totalorder %s25_s26, 4   ;;  %s1677_s25 = sld [smem:[#allocation7_spill]] }
 0x62d   : > { %s1678_s21 = smov %s1356_s22  ;;  %s1679_s22 = smov %s1360_s23 }
 0x62e   : > { %s1680_s23 = smov %s1499_s16  ;;  %24 = sbr.rel (!%p22_p10) target bundleno = 7 (0x7), region = 112 }
 0x633   :  { %1028 = vsyncpa [#allocation4], 1 }
 0x634   :  { %1030 = vsyncpa [#allocation4 + $0x1], 1 }

</bundles_post_ra>
